<compile_context>
chip_gen: v7x
topology: tpu7x:2x2x1
jax: 0.10.0
libtpu: 0.0.40
codegen_flags: <defaults>
</compile_context>

<pallas_src>
import functools

import jax
import jax.numpy as jnp
from jax.experimental import pallas as pl
from jax.experimental.pallas import tpu as pltpu

DILATIONS = (2, 4, 8, 16, 32)
KSIZE = 7
HALF_K = KSIZE // 2
N_LAYERS = len(DILATIONS)
MAXPAD = HALF_K * max(DILATIONS)   # 96 — widest 'same' padding needed
PAD = 128                          # lane-aligned padding (next multiple of 128 >= MAXPAD)


def outer_diconv_kernel(x_ref, w_ref, o_ref, pad_ref, taps_ref, *,
                        block_b, n_ch, length):
    # x_ref   : (block_b, C, L)            current batch block
    # w_ref   : (5, C, K*C+1)              lane-dense packed weights, bias fused as last column
    # o_ref   : (block_b, C, L)
    # pad_ref : (C, block_b*(L+2*PAD))     padded activation staging (per-batch segments)
    # taps_ref: (K*C+1, block_b*L)         im2col buffer; last row is constant ones (bias)
    C, L, Bb = n_ch, length, block_b
    SEG = L + 2 * PAD
    KC = KSIZE * C
    W = Bb * L

    # Zero only the pad flanks — the centers are overwritten every layer and the
    # flanks are never written. Done every grid step (safe under "parallel").
    zero_flank = jnp.zeros((C, PAD), jnp.float32)
    for b in range(Bb):
        base = b * SEG
        pad_ref[:, base:base + PAD] = zero_flank
        pad_ref[:, base + PAD + L:base + SEG] = zero_flank

    # Constant ones row: fuses the per-layer bias into the MXU contraction.
    taps_ref[KC:KC + 1, :] = jnp.ones((1, W), jnp.float32)

    # Stage the input at the lane-aligned center of each batch segment.
    for b in range(Bb):
        pad_ref[:, b * SEG + PAD:b * SEG + PAD + L] = x_ref[b].astype(jnp.float32)

    cur = None
    for layer, d in enumerate(DILATIONS):
        if layer > 0:
            # Write previous layer's output back to the (aligned) segment centers.
            for b in range(Bb):
                pad_ref[:, b * SEG + PAD:b * SEG + PAD + L] = cur[:, b * L:(b + 1) * L]

        # im2col: gather the 7 dilated taps into one contiguous (K*C, block_b*L) slab.
        for k in range(KSIZE):
            off = PAD + (k - HALF_K) * d          # static offset, always in-bounds
            for b in range(Bb):
                taps_ref[k * C:(k + 1) * C, b * L:(b + 1) * L] = \
                    pad_ref[:, b * SEG + off:b * SEG + off + L]

        # One MXU matmul per layer (bias fused via the ones row), f32 accumulate.
        cur = jnp.dot(w_ref[layer], taps_ref[...],
                      preferred_element_type=jnp.float32)

    # TODO(synk): nn.Dropout(p=0.2) is identity in eval mode; training-mode RNG mask not implemented.
    # (The LeakyReLU in InnerDiConvBlock is discarded by the PyTorch source, so no activation here.)
    for b in range(Bb):                            # residual connection: out += x
        o_ref[b] = (cur[:, b * L:(b + 1) * L]
                    + x_ref[b].astype(jnp.float32)).astype(o_ref.dtype)


def outer_diconv_block(x, weights, biases, *, block_b=None):
    """x: (B, C, L) f32; weights: PyTorch Conv1d layout (5, C_out, C_in, K); biases: (5, C)."""
    B, C, L = x.shape
    if block_b is None:
        block_b = B if B <= 2 else 2
    assert B % block_b == 0, "batch must be divisible by block_b"
    KC = KSIZE * C

    # Host-side repack to a lane-dense per-layer slab:
    #   w_packed[l, o, k*C + i] = weights[l, o, i, k];  bias fused as the last column.
    w_packed = jnp.transpose(weights, (0, 1, 3, 2)).reshape(N_LAYERS, C, KC)
    w_aug = jnp.concatenate(
        [w_packed, biases[:, :, None].astype(w_packed.dtype)], axis=-1)   # (5, C, K*C+1)

    SEG = L + 2 * PAD
    kernel = functools.partial(outer_diconv_kernel,
                               block_b=block_b, n_ch=C, length=L)
    return pl.pallas_call(
        kernel,
        out_shape=jax.ShapeDtypeStruct((B, C, L), x.dtype),
        grid_spec=pltpu.PrefetchScalarGridSpec(
            num_scalar_prefetch=0,
            grid=(B // block_b,),
            in_specs=[
                pl.BlockSpec((block_b, C, L), lambda i: (i, 0, 0)),
                pl.BlockSpec((N_LAYERS, C, KC + 1), lambda i: (0, 0, 0)),
            ],
            out_specs=pl.BlockSpec((block_b, C, L), lambda i: (i, 0, 0)),
            scratch_shapes=[
                pltpu.VMEM((C, block_b * SEG), jnp.float32),        # padded activations
                pltpu.VMEM((KC + 1, block_b * L), jnp.float32),     # im2col taps (+ ones row)
            ],
        ),
        # Batch axis is independent -> parallel (uses both TensorCores on v7x;
        # harmless on single-TC v5e/v6e).
        compiler_params=pltpu.CompilerParams(dimension_semantics=("parallel",)),
    )(x, w_aug)


def reference(x, weights, biases):
    """Pure-JAX reference of the same forward pass (PyTorch Conv1d weight layout)."""
    B, C, L = x.shape
    cur = x.astype(jnp.float32)
    for layer, d in enumerate(DILATIONS):
        pad = HALF_K * d
        xp = jnp.pad(cur, ((0, 0), (0, 0), (pad, pad)))
        out = jnp.broadcast_to(biases[layer][None, :, None], (B, C, L)).astype(jnp.float32)
        for k in range(KSIZE):
            tap = xp[:, :, k * d:k * d + L]
            out = out + jnp.einsum('oi,bil->bol', weights[layer, :, :, k], tap)
        cur = out
    return cur + x


if __name__ == "__main__":
    B, C, L = 4, 4, 128
    key = jax.random.PRNGKey(0)
    kx, kw, kb = jax.random.split(key, 3)

    x = jax.random.normal(kx, (B, C, L), dtype=jnp.float32)
    # PyTorch Conv1d weight layout per layer: (out_channels, in_channels, kernel_size).
    weights = jax.random.normal(kw, (N_LAYERS, C, C, KSIZE), dtype=jnp.float32) * 0.1
    biases = jax.random.normal(kb, (N_LAYERS, C), dtype=jnp.float32) * 0.1

    out = jax.block_until_ready(outer_diconv_block(x, weights, biases, block_b=2))
    ref = jax.block_until_ready(reference(x, weights, biases))

    max_err = float(jnp.max(jnp.abs(out - ref)))
    assert jnp.allclose(out, ref, atol=1e-4, rtol=1e-4), f"max abs err {max_err}"

    print("KERNEL_OK")
</pallas_src>

<mosaic_0001>
module attributes {stable_mosaic.version = 11 : i64} {
  func.func @outer_diconv_kernel(%arg0: i32, %arg1: memref<2x4x128xf32, #tpu.memory_space<vmem>>, %arg2: memref<5x4x29xf32, #tpu.memory_space<vmem>>, %arg3: memref<2x4x128xf32, #tpu.memory_space<vmem>>, %arg4: memref<4x768xf32, #tpu.memory_space<vmem>>, %arg5: memref<29x256xf32, #tpu.memory_space<vmem>>) attributes {dimension_semantics = [#tpu.dimension_semantics<parallel>], iteration_bounds = array<i64: 2>, scalar_prefetch = 0 : i64, scratch_operands = 2 : i64, tpu.core_type = #tpu.core_type<tc>, window_params = [{transform_indices = @transform_0, window_bounds = array<i64: 2, 4, 128>}, {pipeline_mode = #tpu.pipeline_mode<synchronous>, transform_indices = @transform_1, window_bounds = array<i64: 5, 4, 29>}, {transform_indices = @transform_2, window_bounds = array<i64: 2, 4, 128>}]} {
    %cst = arith.constant 0.000000e+00 : f32
    %0 = vector.broadcast %cst : f32 to vector<4x128xf32>
    %c0 = arith.constant 0 : index
    %c0_0 = arith.constant 0 : index
    %1 = vector.load %arg4[%c0, %c0_0] : memref<4x768xf32, #tpu.memory_space<vmem>>, vector<4x128xf32>
    tpu.vector_store %arg4[%c0, %c0_0], %0 {strides = array<i32>} : memref<4x768xf32, #tpu.memory_space<vmem>>, vector<4x128xf32>,
    %c0_1 = arith.constant 0 : index
    %c256 = arith.constant 256 : index
    %2 = vector.load %arg4[%c0_1, %c256] : memref<4x768xf32, #tpu.memory_space<vmem>>, vector<4x128xf32>
    tpu.vector_store %arg4[%c0_1, %c256], %0 {strides = array<i32>} : memref<4x768xf32, #tpu.memory_space<vmem>>, vector<4x128xf32>,
    %c0_2 = arith.constant 0 : index
    %c384 = arith.constant 384 : index
    %3 = vector.load %arg4[%c0_2, %c384] : memref<4x768xf32, #tpu.memory_space<vmem>>, vector<4x128xf32>
    tpu.vector_store %arg4[%c0_2, %c384], %0 {strides = array<i32>} : memref<4x768xf32, #tpu.memory_space<vmem>>, vector<4x128xf32>,
    %c0_3 = arith.constant 0 : index
    %c640 = arith.constant 640 : index
    %4 = vector.load %arg4[%c0_3, %c640] : memref<4x768xf32, #tpu.memory_space<vmem>>, vector<4x128xf32>
    tpu.vector_store %arg4[%c0_3, %c640], %0 {strides = array<i32>} : memref<4x768xf32, #tpu.memory_space<vmem>>, vector<4x128xf32>,
    %cst_4 = arith.constant 1.000000e+00 : f32
    %5 = vector.broadcast %cst_4 : f32 to vector<1x256xf32>
    %c28 = arith.constant 28 : index
    %c0_5 = arith.constant 0 : index
    %6 = vector.load %arg5[%c28, %c0_5] : memref<29x256xf32, #tpu.memory_space<vmem>>, vector<1x256xf32>
    tpu.vector_store %arg5[%c28, %c0_5], %5 {strides = array<i32>} : memref<29x256xf32, #tpu.memory_space<vmem>>, vector<1x256xf32>,
    %c0_6 = arith.constant 0 : index
    %c0_7 = arith.constant 0 : index
    %c0_8 = arith.constant 0 : index
    %7 = vector.load %arg1[%c0_6, %c0_7, %c0_8] : memref<2x4x128xf32, #tpu.memory_space<vmem>>, vector<1x4x128xf32>
    %8 = vector.shape_cast %7 : vector<1x4x128xf32> to vector<4x128xf32>
    %c0_9 = arith.constant 0 : index
    %c128 = arith.constant 128 : index
    %9 = vector.load %arg4[%c0_9, %c128] : memref<4x768xf32, #tpu.memory_space<vmem>>, vector<4x128xf32>
    tpu.vector_store %arg4[%c0_9, %c128], %8 {strides = array<i32>} : memref<4x768xf32, #tpu.memory_space<vmem>>, vector<4x128xf32>,
    %c1 = arith.constant 1 : index
    %c0_10 = arith.constant 0 : index
    %c0_11 = arith.constant 0 : index
    %10 = vector.load %arg1[%c1, %c0_10, %c0_11] : memref<2x4x128xf32, #tpu.memory_space<vmem>>, vector<1x4x128xf32>
    %11 = vector.shape_cast %10 : vector<1x4x128xf32> to vector<4x128xf32>
    %c0_12 = arith.constant 0 : index
    %c512 = arith.constant 512 : index
    %12 = vector.load %arg4[%c0_12, %c512] : memref<4x768xf32, #tpu.memory_space<vmem>>, vector<4x128xf32>
    tpu.vector_store %arg4[%c0_12, %c512], %11 {strides = array<i32>} : memref<4x768xf32, #tpu.memory_space<vmem>>, vector<4x128xf32>,
    %c0_13 = arith.constant 0 : index
    %c122 = arith.constant 122 : index
    %13 = vector.load %arg4[%c0_13, %c122] : memref<4x768xf32, #tpu.memory_space<vmem>>, vector<4x128xf32>
    %c0_14 = arith.constant 0 : index
    %c0_15 = arith.constant 0 : index
    %14 = vector.load %arg5[%c0_14, %c0_15] : memref<29x256xf32, #tpu.memory_space<vmem>>, vector<4x128xf32>
    tpu.vector_store %arg5[%c0_14, %c0_15], %13 {strides = array<i32>} : memref<29x256xf32, #tpu.memory_space<vmem>>, vector<4x128xf32>,
    %c0_16 = arith.constant 0 : index
    %c506 = arith.constant 506 : index
    %15 = vector.load %arg4[%c0_16, %c506] : memref<4x768xf32, #tpu.memory_space<vmem>>, vector<4x128xf32>
    %c0_17 = arith.constant 0 : index
    %c128_18 = arith.constant 128 : index
    %16 = vector.load %arg5[%c0_17, %c128_18] : memref<29x256xf32, #tpu.memory_space<vmem>>, vector<4x128xf32>
    tpu.vector_store %arg5[%c0_17, %c128_18], %15 {strides = array<i32>} : memref<29x256xf32, #tpu.memory_space<vmem>>, vector<4x128xf32>,
    %c0_19 = arith.constant 0 : index
    %c124 = arith.constant 124 : index
    %17 = vector.load %arg4[%c0_19, %c124] : memref<4x768xf32, #tpu.memory_space<vmem>>, vector<4x128xf32>
    %c4 = arith.constant 4 : index
    %c0_20 = arith.constant 0 : index
    %18 = vector.load %arg5[%c4, %c0_20] : memref<29x256xf32, #tpu.memory_space<vmem>>, vector<4x128xf32>
    tpu.vector_store %arg5[%c4, %c0_20], %17 {strides = array<i32>} : memref<29x256xf32, #tpu.memory_space<vmem>>, vector<4x128xf32>,
    %c0_21 = arith.constant 0 : index
    %c508 = arith.constant 508 : index
    %19 = vector.load %arg4[%c0_21, %c508] : memref<4x768xf32, #tpu.memory_space<vmem>>, vector<4x128xf32>
    %c4_22 = arith.constant 4 : index
    %c128_23 = arith.constant 128 : index
    %20 = vector.load %arg5[%c4_22, %c128_23] : memref<29x256xf32, #tpu.memory_space<vmem>>, vector<4x128xf32>
    tpu.vector_store %arg5[%c4_22, %c128_23], %19 {strides = array<i32>} : memref<29x256xf32, #tpu.memory_space<vmem>>, vector<4x128xf32>,
    %c0_24 = arith.constant 0 : index
    %c126 = arith.constant 126 : index
    %21 = vector.load %arg4[%c0_24, %c126] : memref<4x768xf32, #tpu.memory_space<vmem>>, vector<4x128xf32>
    %c8 = arith.constant 8 : index
    %c0_25 = arith.constant 0 : index
    %22 = vector.load %arg5[%c8, %c0_25] : memref<29x256xf32, #tpu.memory_space<vmem>>, vector<4x128xf32>
    tpu.vector_store %arg5[%c8, %c0_25], %21 {strides = array<i32>} : memref<29x256xf32, #tpu.memory_space<vmem>>, vector<4x128xf32>,
    %c0_26 = arith.constant 0 : index
    %c510 = arith.constant 510 : index
    %23 = vector.load %arg4[%c0_26, %c510] : memref<4x768xf32, #tpu.memory_space<vmem>>, vector<4x128xf32>
    %c8_27 = arith.constant 8 : index
    %c128_28 = arith.constant 128 : index
    %24 = vector.load %arg5[%c8_27, %c128_28] : memref<29x256xf32, #tpu.memory_space<vmem>>, vector<4x128xf32>
    tpu.vector_store %arg5[%c8_27, %c128_28], %23 {strides = array<i32>} : memref<29x256xf32, #tpu.memory_space<vmem>>, vector<4x128xf32>,
    %c0_29 = arith.constant 0 : index
    %c128_30 = arith.constant 128 : index
    %25 = vector.load %arg4[%c0_29, %c128_30] : memref<4x768xf32, #tpu.memory_space<vmem>>, vector<4x128xf32>
    %c12 = arith.constant 12 : index
    %c0_31 = arith.constant 0 : index
    %26 = vector.load %arg5[%c12, %c0_31] : memref<29x256xf32, #tpu.memory_space<vmem>>, vector<4x128xf32>
    tpu.vector_store %arg5[%c12, %c0_31], %25 {strides = array<i32>} : memref<29x256xf32, #tpu.memory_space<vmem>>, vector<4x128xf32>,
    %c0_32 = arith.constant 0 : index
    %c512_33 = arith.constant 512 : index
    %27 = vector.load %arg4[%c0_32, %c512_33] : memref<4x768xf32, #tpu.memory_space<vmem>>, vector<4x128xf32>
    %c12_34 = arith.constant 12 : index
    %c128_35 = arith.constant 128 : index
    %28 = vector.load %arg5[%c12_34, %c128_35] : memref<29x256xf32, #tpu.memory_space<vmem>>, vector<4x128xf32>
    tpu.vector_store %arg5[%c12_34, %c128_35], %27 {strides = array<i32>} : memref<29x256xf32, #tpu.memory_space<vmem>>, vector<4x128xf32>,
    %c0_36 = arith.constant 0 : index
    %c130 = arith.constant 130 : index
    %29 = vector.load %arg4[%c0_36, %c130] : memref<4x768xf32, #tpu.memory_space<vmem>>, vector<4x128xf32>
    %c16 = arith.constant 16 : index
    %c0_37 = arith.constant 0 : index
    %30 = vector.load %arg5[%c16, %c0_37] : memref<29x256xf32, #tpu.memory_space<vmem>>, vector<4x128xf32>
    tpu.vector_store %arg5[%c16, %c0_37], %29 {strides = array<i32>} : memref<29x256xf32, #tpu.memory_space<vmem>>, vector<4x128xf32>,
    %c0_38 = arith.constant 0 : index
    %c514 = arith.constant 514 : index
    %31 = vector.load %arg4[%c0_38, %c514] : memref<4x768xf32, #tpu.memory_space<vmem>>, vector<4x128xf32>
    %c16_39 = arith.constant 16 : index
    %c128_40 = arith.constant 128 : index
    %32 = vector.load %arg5[%c16_39, %c128_40] : memref<29x256xf32, #tpu.memory_space<vmem>>, vector<4x128xf32>
    tpu.vector_store %arg5[%c16_39, %c128_40], %31 {strides = array<i32>} : memref<29x256xf32, #tpu.memory_space<vmem>>, vector<4x128xf32>,
    %c0_41 = arith.constant 0 : index
    %c132 = arith.constant 132 : index
    %33 = vector.load %arg4[%c0_41, %c132] : memref<4x768xf32, #tpu.memory_space<vmem>>, vector<4x128xf32>
    %c20 = arith.constant 20 : index
    %c0_42 = arith.constant 0 : index
    %34 = vector.load %arg5[%c20, %c0_42] : memref<29x256xf32, #tpu.memory_space<vmem>>, vector<4x128xf32>
    tpu.vector_store %arg5[%c20, %c0_42], %33 {strides = array<i32>} : memref<29x256xf32, #tpu.memory_space<vmem>>, vector<4x128xf32>,
    %c0_43 = arith.constant 0 : index
    %c516 = arith.constant 516 : index
    %35 = vector.load %arg4[%c0_43, %c516] : memref<4x768xf32, #tpu.memory_space<vmem>>, vector<4x128xf32>
    %c20_44 = arith.constant 20 : index
    %c128_45 = arith.constant 128 : index
    %36 = vector.load %arg5[%c20_44, %c128_45] : memref<29x256xf32, #tpu.memory_space<vmem>>, vector<4x128xf32>
    tpu.vector_store %arg5[%c20_44, %c128_45], %35 {strides = array<i32>} : memref<29x256xf32, #tpu.memory_space<vmem>>, vector<4x128xf32>,
    %c0_46 = arith.constant 0 : index
    %c134 = arith.constant 134 : index
    %37 = vector.load %arg4[%c0_46, %c134] : memref<4x768xf32, #tpu.memory_space<vmem>>, vector<4x128xf32>
    %c24 = arith.constant 24 : index
    %c0_47 = arith.constant 0 : index
    %38 = vector.load %arg5[%c24, %c0_47] : memref<29x256xf32, #tpu.memory_space<vmem>>, vector<4x128xf32>
    tpu.vector_store %arg5[%c24, %c0_47], %37 {strides = array<i32>} : memref<29x256xf32, #tpu.memory_space<vmem>>, vector<4x128xf32>,
    %c0_48 = arith.constant 0 : index
    %c518 = arith.constant 518 : index
    %39 = vector.load %arg4[%c0_48, %c518] : memref<4x768xf32, #tpu.memory_space<vmem>>, vector<4x128xf32>
    %c24_49 = arith.constant 24 : index
    %c128_50 = arith.constant 128 : index
    %40 = vector.load %arg5[%c24_49, %c128_50] : memref<29x256xf32, #tpu.memory_space<vmem>>, vector<4x128xf32>
    tpu.vector_store %arg5[%c24_49, %c128_50], %39 {strides = array<i32>} : memref<29x256xf32, #tpu.memory_space<vmem>>, vector<4x128xf32>,
    %c0_51 = arith.constant 0 : index
    %c0_52 = arith.constant 0 : index
    %c0_53 = arith.constant 0 : index
    %41 = vector.load %arg2[%c0_51, %c0_52, %c0_53] : memref<5x4x29xf32, #tpu.memory_space<vmem>>, vector<1x4x29xf32>
    %42 = vector.shape_cast %41 : vector<1x4x29xf32> to vector<4x29xf32>
    %c0_54 = arith.constant 0 : index
    %c0_55 = arith.constant 0 : index
    %43 = vector.load %arg5[%c0_54, %c0_55] : memref<29x256xf32, #tpu.memory_space<vmem>>, vector<29x256xf32>
    %cst_56 = arith.constant dense<0.000000e+00> : vector<4x256xf32>
    %44 = tpu.matmul %42, %43, %cst_56 {dimension_numbers = #tpu.dot_dimension_numbers<[1], [0], [0], [1], [0, 0, 1, 1], [], []>} : vector<4x29xf32>, vector<29x256xf32>, vector<4x256xf32> -> vector<4x256xf32>
    %45 = vector.extract_strided_slice %44 {offsets = [0, 0], sizes = [4, 128], strides = [1, 1]} : vector<4x256xf32> to vector<4x128xf32>
    %c0_57 = arith.constant 0 : index
    %c128_58 = arith.constant 128 : index
    %46 = vector.load %arg4[%c0_57, %c128_58] : memref<4x768xf32, #tpu.memory_space<vmem>>, vector<4x128xf32>
    tpu.vector_store %arg4[%c0_57, %c128_58], %45 {strides = array<i32>} : memref<4x768xf32, #tpu.memory_space<vmem>>, vector<4x128xf32>,
    %47 = vector.extract_strided_slice %44 {offsets = [0, 128], sizes = [4, 128], strides = [1, 1]} : vector<4x256xf32> to vector<4x128xf32>
    %c0_59 = arith.constant 0 : index
    %c512_60 = arith.constant 512 : index
    %48 = vector.load %arg4[%c0_59, %c512_60] : memref<4x768xf32, #tpu.memory_space<vmem>>, vector<4x128xf32>
    tpu.vector_store %arg4[%c0_59, %c512_60], %47 {strides = array<i32>} : memref<4x768xf32, #tpu.memory_space<vmem>>, vector<4x128xf32>,
    %c0_61 = arith.constant 0 : index
    %c116 = arith.constant 116 : index
    %49 = vector.load %arg4[%c0_61, %c116] : memref<4x768xf32, #tpu.memory_space<vmem>>, vector<4x128xf32>
    %c0_62 = arith.constant 0 : index
    %c0_63 = arith.constant 0 : index
    %50 = vector.load %arg5[%c0_62, %c0_63] : memref<29x256xf32, #tpu.memory_space<vmem>>, vector<4x128xf32>
    tpu.vector_store %arg5[%c0_62, %c0_63], %49 {strides = array<i32>} : memref<29x256xf32, #tpu.memory_space<vmem>>, vector<4x128xf32>,
    %c0_64 = arith.constant 0 : index
    %c500 = arith.constant 500 : index
    %51 = vector.load %arg4[%c0_64, %c500] : memref<4x768xf32, #tpu.memory_space<vmem>>, vector<4x128xf32>
    %c0_65 = arith.constant 0 : index
    %c128_66 = arith.constant 128 : index
    %52 = vector.load %arg5[%c0_65, %c128_66] : memref<29x256xf32, #tpu.memory_space<vmem>>, vector<4x128xf32>
    tpu.vector_store %arg5[%c0_65, %c128_66], %51 {strides = array<i32>} : memref<29x256xf32, #tpu.memory_space<vmem>>, vector<4x128xf32>,
    %c0_67 = arith.constant 0 : index
    %c120 = arith.constant 120 : index
    %53 = vector.load %arg4[%c0_67, %c120] : memref<4x768xf32, #tpu.memory_space<vmem>>, vector<4x128xf32>
    %c4_68 = arith.constant 4 : index
    %c0_69 = arith.constant 0 : index
    %54 = vector.load %arg5[%c4_68, %c0_69] : memref<29x256xf32, #tpu.memory_space<vmem>>, vector<4x128xf32>
    tpu.vector_store %arg5[%c4_68, %c0_69], %53 {strides = array<i32>} : memref<29x256xf32, #tpu.memory_space<vmem>>, vector<4x128xf32>,
    %c0_70 = arith.constant 0 : index
    %c504 = arith.constant 504 : index
    %55 = vector.load %arg4[%c0_70, %c504] : memref<4x768xf32, #tpu.memory_space<vmem>>, vector<4x128xf32>
    %c4_71 = arith.constant 4 : index
    %c128_72 = arith.constant 128 : index
    %56 = vector.load %arg5[%c4_71, %c128_72] : memref<29x256xf32, #tpu.memory_space<vmem>>, vector<4x128xf32>
    tpu.vector_store %arg5[%c4_71, %c128_72], %55 {strides = array<i32>} : memref<29x256xf32, #tpu.memory_space<vmem>>, vector<4x128xf32>,
    %c0_73 = arith.constant 0 : index
    %c124_74 = arith.constant 124 : index
    %57 = vector.load %arg4[%c0_73, %c124_74] : memref<4x768xf32, #tpu.memory_space<vmem>>, vector<4x128xf32>
    %c8_75 = arith.constant 8 : index
    %c0_76 = arith.constant 0 : index
    %58 = vector.load %arg5[%c8_75, %c0_76] : memref<29x256xf32, #tpu.memory_space<vmem>>, vector<4x128xf32>
    tpu.vector_store %arg5[%c8_75, %c0_76], %57 {strides = array<i32>} : memref<29x256xf32, #tpu.memory_space<vmem>>, vector<4x128xf32>,
    %c0_77 = arith.constant 0 : index
    %c508_78 = arith.constant 508 : index
    %59 = vector.load %arg4[%c0_77, %c508_78] : memref<4x768xf32, #tpu.memory_space<vmem>>, vector<4x128xf32>
    %c8_79 = arith.constant 8 : index
    %c128_80 = arith.constant 128 : index
    %60 = vector.load %arg5[%c8_79, %c128_80] : memref<29x256xf32, #tpu.memory_space<vmem>>, vector<4x128xf32>
    tpu.vector_store %arg5[%c8_79, %c128_80], %59 {strides = array<i32>} : memref<29x256xf32, #tpu.memory_space<vmem>>, vector<4x128xf32>,
    %c0_81 = arith.constant 0 : index
    %c128_82 = arith.constant 128 : index
    %61 = vector.load %arg4[%c0_81, %c128_82] : memref<4x768xf32, #tpu.memory_space<vmem>>, vector<4x128xf32>
    %c12_83 = arith.constant 12 : index
    %c0_84 = arith.constant 0 : index
    %62 = vector.load %arg5[%c12_83, %c0_84] : memref<29x256xf32, #tpu.memory_space<vmem>>, vector<4x128xf32>
    tpu.vector_store %arg5[%c12_83, %c0_84], %61 {strides = array<i32>} : memref<29x256xf32, #tpu.memory_space<vmem>>, vector<4x128xf32>,
    %c0_85 = arith.constant 0 : index
    %c512_86 = arith.constant 512 : index
    %63 = vector.load %arg4[%c0_85, %c512_86] : memref<4x768xf32, #tpu.memory_space<vmem>>, vector<4x128xf32>
    %c12_87 = arith.constant 12 : index
    %c128_88 = arith.constant 128 : index
    %64 = vector.load %arg5[%c12_87, %c128_88] : memref<29x256xf32, #tpu.memory_space<vmem>>, vector<4x128xf32>
    tpu.vector_store %arg5[%c12_87, %c128_88], %63 {strides = array<i32>} : memref<29x256xf32, #tpu.memory_space<vmem>>, vector<4x128xf32>,
    %c0_89 = arith.constant 0 : index
    %c132_90 = arith.constant 132 : index
    %65 = vector.load %arg4[%c0_89, %c132_90] : memref<4x768xf32, #tpu.memory_space<vmem>>, vector<4x128xf32>
    %c16_91 = arith.constant 16 : index
    %c0_92 = arith.constant 0 : index
    %66 = vector.load %arg5[%c16_91, %c0_92] : memref<29x256xf32, #tpu.memory_space<vmem>>, vector<4x128xf32>
    tpu.vector_store %arg5[%c16_91, %c0_92], %65 {strides = array<i32>} : memref<29x256xf32, #tpu.memory_space<vmem>>, vector<4x128xf32>,
    %c0_93 = arith.constant 0 : index
    %c516_94 = arith.constant 516 : index
    %67 = vector.load %arg4[%c0_93, %c516_94] : memref<4x768xf32, #tpu.memory_space<vmem>>, vector<4x128xf32>
    %c16_95 = arith.constant 16 : index
    %c128_96 = arith.constant 128 : index
    %68 = vector.load %arg5[%c16_95, %c128_96] : memref<29x256xf32, #tpu.memory_space<vmem>>, vector<4x128xf32>
    tpu.vector_store %arg5[%c16_95, %c128_96], %67 {strides = array<i32>} : memref<29x256xf32, #tpu.memory_space<vmem>>, vector<4x128xf32>,
    %c0_97 = arith.constant 0 : index
    %c136 = arith.constant 136 : index
    %69 = vector.load %arg4[%c0_97, %c136] : memref<4x768xf32, #tpu.memory_space<vmem>>, vector<4x128xf32>
    %c20_98 = arith.constant 20 : index
    %c0_99 = arith.constant 0 : index
    %70 = vector.load %arg5[%c20_98, %c0_99] : memref<29x256xf32, #tpu.memory_space<vmem>>, vector<4x128xf32>
    tpu.vector_store %arg5[%c20_98, %c0_99], %69 {strides = array<i32>} : memref<29x256xf32, #tpu.memory_space<vmem>>, vector<4x128xf32>,
    %c0_100 = arith.constant 0 : index
    %c520 = arith.constant 520 : index
    %71 = vector.load %arg4[%c0_100, %c520] : memref<4x768xf32, #tpu.memory_space<vmem>>, vector<4x128xf32>
    %c20_101 = arith.constant 20 : index
    %c128_102 = arith.constant 128 : index
    %72 = vector.load %arg5[%c20_101, %c128_102] : memref<29x256xf32, #tpu.memory_space<vmem>>, vector<4x128xf32>
    tpu.vector_store %arg5[%c20_101, %c128_102], %71 {strides = array<i32>} : memref<29x256xf32, #tpu.memory_space<vmem>>, vector<4x128xf32>,
    %c0_103 = arith.constant 0 : index
    %c140 = arith.constant 140 : index
    %73 = vector.load %arg4[%c0_103, %c140] : memref<4x768xf32, #tpu.memory_space<vmem>>, vector<4x128xf32>
    %c24_104 = arith.constant 24 : index
    %c0_105 = arith.constant 0 : index
    %74 = vector.load %arg5[%c24_104, %c0_105] : memref<29x256xf32, #tpu.memory_space<vmem>>, vector<4x128xf32>
    tpu.vector_store %arg5[%c24_104, %c0_105], %73 {strides = array<i32>} : memref<29x256xf32, #tpu.memory_space<vmem>>, vector<4x128xf32>,
    %c0_106 = arith.constant 0 : index
    %c524 = arith.constant 524 : index
    %75 = vector.load %arg4[%c0_106, %c524] : memref<4x768xf32, #tpu.memory_space<vmem>>, vector<4x128xf32>
    %c24_107 = arith.constant 24 : index
    %c128_108 = arith.constant 128 : index
    %76 = vector.load %arg5[%c24_107, %c128_108] : memref<29x256xf32, #tpu.memory_space<vmem>>, vector<4x128xf32>
    tpu.vector_store %arg5[%c24_107, %c128_108], %75 {strides = array<i32>} : memref<29x256xf32, #tpu.memory_space<vmem>>, vector<4x128xf32>,
    %c1_109 = arith.constant 1 : index
    %c0_110 = arith.constant 0 : index
    %c0_111 = arith.constant 0 : index
    %77 = vector.load %arg2[%c1_109, %c0_110, %c0_111] : memref<5x4x29xf32, #tpu.memory_space<vmem>>, vector<1x4x29xf32>
    %78 = vector.shape_cast %77 : vector<1x4x29xf32> to vector<4x29xf32>
    %c0_112 = arith.constant 0 : index
    %c0_113 = arith.constant 0 : index
    %79 = vector.load %arg5[%c0_112, %c0_113] : memref<29x256xf32, #tpu.memory_space<vmem>>, vector<29x256xf32>
    %cst_114 = arith.constant dense<0.000000e+00> : vector<4x256xf32>
    %80 = tpu.matmul %78, %79, %cst_114 {dimension_numbers = #tpu.dot_dimension_numbers<[1], [0], [0], [1], [0, 0, 1, 1], [], []>} : vector<4x29xf32>, vector<29x256xf32>, vector<4x256xf32> -> vector<4x256xf32>
    %81 = vector.extract_strided_slice %80 {offsets = [0, 0], sizes = [4, 128], strides = [1, 1]} : vector<4x256xf32> to vector<4x128xf32>
    %c0_115 = arith.constant 0 : index
    %c128_116 = arith.constant 128 : index
    %82 = vector.load %arg4[%c0_115, %c128_116] : memref<4x768xf32, #tpu.memory_space<vmem>>, vector<4x128xf32>
    tpu.vector_store %arg4[%c0_115, %c128_116], %81 {strides = array<i32>} : memref<4x768xf32, #tpu.memory_space<vmem>>, vector<4x128xf32>,
    %83 = vector.extract_strided_slice %80 {offsets = [0, 128], sizes = [4, 128], strides = [1, 1]} : vector<4x256xf32> to vector<4x128xf32>
    %c0_117 = arith.constant 0 : index
    %c512_118 = arith.constant 512 : index
    %84 = vector.load %arg4[%c0_117, %c512_118] : memref<4x768xf32, #tpu.memory_space<vmem>>, vector<4x128xf32>
    tpu.vector_store %arg4[%c0_117, %c512_118], %83 {strides = array<i32>} : memref<4x768xf32, #tpu.memory_space<vmem>>, vector<4x128xf32>,
    %c0_119 = arith.constant 0 : index
    %c104 = arith.constant 104 : index
    %85 = vector.load %arg4[%c0_119, %c104] : memref<4x768xf32, #tpu.memory_space<vmem>>, vector<4x128xf32>
    %c0_120 = arith.constant 0 : index
    %c0_121 = arith.constant 0 : index
    %86 = vector.load %arg5[%c0_120, %c0_121] : memref<29x256xf32, #tpu.memory_space<vmem>>, vector<4x128xf32>
    tpu.vector_store %arg5[%c0_120, %c0_121], %85 {strides = array<i32>} : memref<29x256xf32, #tpu.memory_space<vmem>>, vector<4x128xf32>,
    %c0_122 = arith.constant 0 : index
    %c488 = arith.constant 488 : index
    %87 = vector.load %arg4[%c0_122, %c488] : memref<4x768xf32, #tpu.memory_space<vmem>>, vector<4x128xf32>
    %c0_123 = arith.constant 0 : index
    %c128_124 = arith.constant 128 : index
    %88 = vector.load %arg5[%c0_123, %c128_124] : memref<29x256xf32, #tpu.memory_space<vmem>>, vector<4x128xf32>
    tpu.vector_store %arg5[%c0_123, %c128_124], %87 {strides = array<i32>} : memref<29x256xf32, #tpu.memory_space<vmem>>, vector<4x128xf32>,
    %c0_125 = arith.constant 0 : index
    %c112 = arith.constant 112 : index
    %89 = vector.load %arg4[%c0_125, %c112] : memref<4x768xf32, #tpu.memory_space<vmem>>, vector<4x128xf32>
    %c4_126 = arith.constant 4 : index
    %c0_127 = arith.constant 0 : index
    %90 = vector.load %arg5[%c4_126, %c0_127] : memref<29x256xf32, #tpu.memory_space<vmem>>, vector<4x128xf32>
    tpu.vector_store %arg5[%c4_126, %c0_127], %89 {strides = array<i32>} : memref<29x256xf32, #tpu.memory_space<vmem>>, vector<4x128xf32>,
    %c0_128 = arith.constant 0 : index
    %c496 = arith.constant 496 : index
    %91 = vector.load %arg4[%c0_128, %c496] : memref<4x768xf32, #tpu.memory_space<vmem>>, vector<4x128xf32>
    %c4_129 = arith.constant 4 : index
    %c128_130 = arith.constant 128 : index
    %92 = vector.load %arg5[%c4_129, %c128_130] : memref<29x256xf32, #tpu.memory_space<vmem>>, vector<4x128xf32>
    tpu.vector_store %arg5[%c4_129, %c128_130], %91 {strides = array<i32>} : memref<29x256xf32, #tpu.memory_space<vmem>>, vector<4x128xf32>,
    %c0_131 = arith.constant 0 : index
    %c120_132 = arith.constant 120 : index
    %93 = vector.load %arg4[%c0_131, %c120_132] : memref<4x768xf32, #tpu.memory_space<vmem>>, vector<4x128xf32>
    %c8_133 = arith.constant 8 : index
    %c0_134 = arith.constant 0 : index
    %94 = vector.load %arg5[%c8_133, %c0_134] : memref<29x256xf32, #tpu.memory_space<vmem>>, vector<4x128xf32>
    tpu.vector_store %arg5[%c8_133, %c0_134], %93 {strides = array<i32>} : memref<29x256xf32, #tpu.memory_space<vmem>>, vector<4x128xf32>,
    %c0_135 = arith.constant 0 : index
    %c504_136 = arith.constant 504 : index
    %95 = vector.load %arg4[%c0_135, %c504_136] : memref<4x768xf32, #tpu.memory_space<vmem>>, vector<4x128xf32>
    %c8_137 = arith.constant 8 : index
    %c128_138 = arith.constant 128 : index
    %96 = vector.load %arg5[%c8_137, %c128_138] : memref<29x256xf32, #tpu.memory_space<vmem>>, vector<4x128xf32>
    tpu.vector_store %arg5[%c8_137, %c128_138], %95 {strides = array<i32>} : memref<29x256xf32, #tpu.memory_space<vmem>>, vector<4x128xf32>,
    %c0_139 = arith.constant 0 : index
    %c128_140 = arith.constant 128 : index
    %97 = vector.load %arg4[%c0_139, %c128_140] : memref<4x768xf32, #tpu.memory_space<vmem>>, vector<4x128xf32>
    %c12_141 = arith.constant 12 : index
    %c0_142 = arith.constant 0 : index
    %98 = vector.load %arg5[%c12_141, %c0_142] : memref<29x256xf32, #tpu.memory_space<vmem>>, vector<4x128xf32>
    tpu.vector_store %arg5[%c12_141, %c0_142], %97 {strides = array<i32>} : memref<29x256xf32, #tpu.memory_space<vmem>>, vector<4x128xf32>,
    %c0_143 = arith.constant 0 : index
    %c512_144 = arith.constant 512 : index
    %99 = vector.load %arg4[%c0_143, %c512_144] : memref<4x768xf32, #tpu.memory_space<vmem>>, vector<4x128xf32>
    %c12_145 = arith.constant 12 : index
    %c128_146 = arith.constant 128 : index
    %100 = vector.load %arg5[%c12_145, %c128_146] : memref<29x256xf32, #tpu.memory_space<vmem>>, vector<4x128xf32>
    tpu.vector_store %arg5[%c12_145, %c128_146], %99 {strides = array<i32>} : memref<29x256xf32, #tpu.memory_space<vmem>>, vector<4x128xf32>,
    %c0_147 = arith.constant 0 : index
    %c136_148 = arith.constant 136 : index
    %101 = vector.load %arg4[%c0_147, %c136_148] : memref<4x768xf32, #tpu.memory_space<vmem>>, vector<4x128xf32>
    %c16_149 = arith.constant 16 : index
    %c0_150 = arith.constant 0 : index
    %102 = vector.load %arg5[%c16_149, %c0_150] : memref<29x256xf32, #tpu.memory_space<vmem>>, vector<4x128xf32>
    tpu.vector_store %arg5[%c16_149, %c0_150], %101 {strides = array<i32>} : memref<29x256xf32, #tpu.memory_space<vmem>>, vector<4x128xf32>,
    %c0_151 = arith.constant 0 : index
    %c520_152 = arith.constant 520 : index
    %103 = vector.load %arg4[%c0_151, %c520_152] : memref<4x768xf32, #tpu.memory_space<vmem>>, vector<4x128xf32>
    %c16_153 = arith.constant 16 : index
    %c128_154 = arith.constant 128 : index
    %104 = vector.load %arg5[%c16_153, %c128_154] : memref<29x256xf32, #tpu.memory_space<vmem>>, vector<4x128xf32>
    tpu.vector_store %arg5[%c16_153, %c128_154], %103 {strides = array<i32>} : memref<29x256xf32, #tpu.memory_space<vmem>>, vector<4x128xf32>,
    %c0_155 = arith.constant 0 : index
    %c144 = arith.constant 144 : index
    %105 = vector.load %arg4[%c0_155, %c144] : memref<4x768xf32, #tpu.memory_space<vmem>>, vector<4x128xf32>
    %c20_156 = arith.constant 20 : index
    %c0_157 = arith.constant 0 : index
    %106 = vector.load %arg5[%c20_156, %c0_157] : memref<29x256xf32, #tpu.memory_space<vmem>>, vector<4x128xf32>
    tpu.vector_store %arg5[%c20_156, %c0_157], %105 {strides = array<i32>} : memref<29x256xf32, #tpu.memory_space<vmem>>, vector<4x128xf32>,
    %c0_158 = arith.constant 0 : index
    %c528 = arith.constant 528 : index
    %107 = vector.load %arg4[%c0_158, %c528] : memref<4x768xf32, #tpu.memory_space<vmem>>, vector<4x128xf32>
    %c20_159 = arith.constant 20 : index
    %c128_160 = arith.constant 128 : index
    %108 = vector.load %arg5[%c20_159, %c128_160] : memref<29x256xf32, #tpu.memory_space<vmem>>, vector<4x128xf32>
    tpu.vector_store %arg5[%c20_159, %c128_160], %107 {strides = array<i32>} : memref<29x256xf32, #tpu.memory_space<vmem>>, vector<4x128xf32>,
    %c0_161 = arith.constant 0 : index
    %c152 = arith.constant 152 : index
    %109 = vector.load %arg4[%c0_161, %c152] : memref<4x768xf32, #tpu.memory_space<vmem>>, vector<4x128xf32>
    %c24_162 = arith.constant 24 : index
    %c0_163 = arith.constant 0 : index
    %110 = vector.load %arg5[%c24_162, %c0_163] : memref<29x256xf32, #tpu.memory_space<vmem>>, vector<4x128xf32>
    tpu.vector_store %arg5[%c24_162, %c0_163], %109 {strides = array<i32>} : memref<29x256xf32, #tpu.memory_space<vmem>>, vector<4x128xf32>,
    %c0_164 = arith.constant 0 : index
    %c536 = arith.constant 536 : index
    %111 = vector.load %arg4[%c0_164, %c536] : memref<4x768xf32, #tpu.memory_space<vmem>>, vector<4x128xf32>
    %c24_165 = arith.constant 24 : index
    %c128_166 = arith.constant 128 : index
    %112 = vector.load %arg5[%c24_165, %c128_166] : memref<29x256xf32, #tpu.memory_space<vmem>>, vector<4x128xf32>
    tpu.vector_store %arg5[%c24_165, %c128_166], %111 {strides = array<i32>} : memref<29x256xf32, #tpu.memory_space<vmem>>, vector<4x128xf32>,
    %c2 = arith.constant 2 : index
    %c0_167 = arith.constant 0 : index
    %c0_168 = arith.constant 0 : index
    %113 = vector.load %arg2[%c2, %c0_167, %c0_168] : memref<5x4x29xf32, #tpu.memory_space<vmem>>, vector<1x4x29xf32>
    %114 = vector.shape_cast %113 : vector<1x4x29xf32> to vector<4x29xf32>
    %c0_169 = arith.constant 0 : index
    %c0_170 = arith.constant 0 : index
    %115 = vector.load %arg5[%c0_169, %c0_170] : memref<29x256xf32, #tpu.memory_space<vmem>>, vector<29x256xf32>
    %cst_171 = arith.constant dense<0.000000e+00> : vector<4x256xf32>
    %116 = tpu.matmul %114, %115, %cst_171 {dimension_numbers = #tpu.dot_dimension_numbers<[1], [0], [0], [1], [0, 0, 1, 1], [], []>} : vector<4x29xf32>, vector<29x256xf32>, vector<4x256xf32> -> vector<4x256xf32>
    %117 = vector.extract_strided_slice %116 {offsets = [0, 0], sizes = [4, 128], strides = [1, 1]} : vector<4x256xf32> to vector<4x128xf32>
    %c0_172 = arith.constant 0 : index
    %c128_173 = arith.constant 128 : index
    %118 = vector.load %arg4[%c0_172, %c128_173] : memref<4x768xf32, #tpu.memory_space<vmem>>, vector<4x128xf32>
    tpu.vector_store %arg4[%c0_172, %c128_173], %117 {strides = array<i32>} : memref<4x768xf32, #tpu.memory_space<vmem>>, vector<4x128xf32>,
    %119 = vector.extract_strided_slice %116 {offsets = [0, 128], sizes = [4, 128], strides = [1, 1]} : vector<4x256xf32> to vector<4x128xf32>
    %c0_174 = arith.constant 0 : index
    %c512_175 = arith.constant 512 : index
    %120 = vector.load %arg4[%c0_174, %c512_175] : memref<4x768xf32, #tpu.memory_space<vmem>>, vector<4x128xf32>
    tpu.vector_store %arg4[%c0_174, %c512_175], %119 {strides = array<i32>} : memref<4x768xf32, #tpu.memory_space<vmem>>, vector<4x128xf32>,
    %c0_176 = arith.constant 0 : index
    %c80 = arith.constant 80 : index
    %121 = vector.load %arg4[%c0_176, %c80] : memref<4x768xf32, #tpu.memory_space<vmem>>, vector<4x128xf32>
    %c0_177 = arith.constant 0 : index
    %c0_178 = arith.constant 0 : index
    %122 = vector.load %arg5[%c0_177, %c0_178] : memref<29x256xf32, #tpu.memory_space<vmem>>, vector<4x128xf32>
    tpu.vector_store %arg5[%c0_177, %c0_178], %121 {strides = array<i32>} : memref<29x256xf32, #tpu.memory_space<vmem>>, vector<4x128xf32>,
    %c0_179 = arith.constant 0 : index
    %c464 = arith.constant 464 : index
    %123 = vector.load %arg4[%c0_179, %c464] : memref<4x768xf32, #tpu.memory_space<vmem>>, vector<4x128xf32>
    %c0_180 = arith.constant 0 : index
    %c128_181 = arith.constant 128 : index
    %124 = vector.load %arg5[%c0_180, %c128_181] : memref<29x256xf32, #tpu.memory_space<vmem>>, vector<4x128xf32>
    tpu.vector_store %arg5[%c0_180, %c128_181], %123 {strides = array<i32>} : memref<29x256xf32, #tpu.memory_space<vmem>>, vector<4x128xf32>,
    %c0_182 = arith.constant 0 : index
    %c96 = arith.constant 96 : index
    %125 = vector.load %arg4[%c0_182, %c96] : memref<4x768xf32, #tpu.memory_space<vmem>>, vector<4x128xf32>
    %c4_183 = arith.constant 4 : index
    %c0_184 = arith.constant 0 : index
    %126 = vector.load %arg5[%c4_183, %c0_184] : memref<29x256xf32, #tpu.memory_space<vmem>>, vector<4x128xf32>
    tpu.vector_store %arg5[%c4_183, %c0_184], %125 {strides = array<i32>} : memref<29x256xf32, #tpu.memory_space<vmem>>, vector<4x128xf32>,
    %c0_185 = arith.constant 0 : index
    %c480 = arith.constant 480 : index
    %127 = vector.load %arg4[%c0_185, %c480] : memref<4x768xf32, #tpu.memory_space<vmem>>, vector<4x128xf32>
    %c4_186 = arith.constant 4 : index
    %c128_187 = arith.constant 128 : index
    %128 = vector.load %arg5[%c4_186, %c128_187] : memref<29x256xf32, #tpu.memory_space<vmem>>, vector<4x128xf32>
    tpu.vector_store %arg5[%c4_186, %c128_187], %127 {strides = array<i32>} : memref<29x256xf32, #tpu.memory_space<vmem>>, vector<4x128xf32>,
    %c0_188 = arith.constant 0 : index
    %c112_189 = arith.constant 112 : index
    %129 = vector.load %arg4[%c0_188, %c112_189] : memref<4x768xf32, #tpu.memory_space<vmem>>, vector<4x128xf32>
    %c8_190 = arith.constant 8 : index
    %c0_191 = arith.constant 0 : index
    %130 = vector.load %arg5[%c8_190, %c0_191] : memref<29x256xf32, #tpu.memory_space<vmem>>, vector<4x128xf32>
    tpu.vector_store %arg5[%c8_190, %c0_191], %129 {strides = array<i32>} : memref<29x256xf32, #tpu.memory_space<vmem>>, vector<4x128xf32>,
    %c0_192 = arith.constant 0 : index
    %c496_193 = arith.constant 496 : index
    %131 = vector.load %arg4[%c0_192, %c496_193] : memref<4x768xf32, #tpu.memory_space<vmem>>, vector<4x128xf32>
    %c8_194 = arith.constant 8 : index
    %c128_195 = arith.constant 128 : index
    %132 = vector.load %arg5[%c8_194, %c128_195] : memref<29x256xf32, #tpu.memory_space<vmem>>, vector<4x128xf32>
    tpu.vector_store %arg5[%c8_194, %c128_195], %131 {strides = array<i32>} : memref<29x256xf32, #tpu.memory_space<vmem>>, vector<4x128xf32>,
    %c0_196 = arith.constant 0 : index
    %c128_197 = arith.constant 128 : index
    %133 = vector.load %arg4[%c0_196, %c128_197] : memref<4x768xf32, #tpu.memory_space<vmem>>, vector<4x128xf32>
    %c12_198 = arith.constant 12 : index
    %c0_199 = arith.constant 0 : index
    %134 = vector.load %arg5[%c12_198, %c0_199] : memref<29x256xf32, #tpu.memory_space<vmem>>, vector<4x128xf32>
    tpu.vector_store %arg5[%c12_198, %c0_199], %133 {strides = array<i32>} : memref<29x256xf32, #tpu.memory_space<vmem>>, vector<4x128xf32>,
    %c0_200 = arith.constant 0 : index
    %c512_201 = arith.constant 512 : index
    %135 = vector.load %arg4[%c0_200, %c512_201] : memref<4x768xf32, #tpu.memory_space<vmem>>, vector<4x128xf32>
    %c12_202 = arith.constant 12 : index
    %c128_203 = arith.constant 128 : index
    %136 = vector.load %arg5[%c12_202, %c128_203] : memref<29x256xf32, #tpu.memory_space<vmem>>, vector<4x128xf32>
    tpu.vector_store %arg5[%c12_202, %c128_203], %135 {strides = array<i32>} : memref<29x256xf32, #tpu.memory_space<vmem>>, vector<4x128xf32>,
    %c0_204 = arith.constant 0 : index
    %c144_205 = arith.constant 144 : index
    %137 = vector.load %arg4[%c0_204, %c144_205] : memref<4x768xf32, #tpu.memory_space<vmem>>, vector<4x128xf32>
    %c16_206 = arith.constant 16 : index
    %c0_207 = arith.constant 0 : index
    %138 = vector.load %arg5[%c16_206, %c0_207] : memref<29x256xf32, #tpu.memory_space<vmem>>, vector<4x128xf32>
    tpu.vector_store %arg5[%c16_206, %c0_207], %137 {strides = array<i32>} : memref<29x256xf32, #tpu.memory_space<vmem>>, vector<4x128xf32>,
    %c0_208 = arith.constant 0 : index
    %c528_209 = arith.constant 528 : index
    %139 = vector.load %arg4[%c0_208, %c528_209] : memref<4x768xf32, #tpu.memory_space<vmem>>, vector<4x128xf32>
    %c16_210 = arith.constant 16 : index
    %c128_211 = arith.constant 128 : index
    %140 = vector.load %arg5[%c16_210, %c128_211] : memref<29x256xf32, #tpu.memory_space<vmem>>, vector<4x128xf32>
    tpu.vector_store %arg5[%c16_210, %c128_211], %139 {strides = array<i32>} : memref<29x256xf32, #tpu.memory_space<vmem>>, vector<4x128xf32>,
    %c0_212 = arith.constant 0 : index
    %c160 = arith.constant 160 : index
    %141 = vector.load %arg4[%c0_212, %c160] : memref<4x768xf32, #tpu.memory_space<vmem>>, vector<4x128xf32>
    %c20_213 = arith.constant 20 : index
    %c0_214 = arith.constant 0 : index
    %142 = vector.load %arg5[%c20_213, %c0_214] : memref<29x256xf32, #tpu.memory_space<vmem>>, vector<4x128xf32>
    tpu.vector_store %arg5[%c20_213, %c0_214], %141 {strides = array<i32>} : memref<29x256xf32, #tpu.memory_space<vmem>>, vector<4x128xf32>,
    %c0_215 = arith.constant 0 : index
    %c544 = arith.constant 544 : index
    %143 = vector.load %arg4[%c0_215, %c544] : memref<4x768xf32, #tpu.memory_space<vmem>>, vector<4x128xf32>
    %c20_216 = arith.constant 20 : index
    %c128_217 = arith.constant 128 : index
    %144 = vector.load %arg5[%c20_216, %c128_217] : memref<29x256xf32, #tpu.memory_space<vmem>>, vector<4x128xf32>
    tpu.vector_store %arg5[%c20_216, %c128_217], %143 {strides = array<i32>} : memref<29x256xf32, #tpu.memory_space<vmem>>, vector<4x128xf32>,
    %c0_218 = arith.constant 0 : index
    %c176 = arith.constant 176 : index
    %145 = vector.load %arg4[%c0_218, %c176] : memref<4x768xf32, #tpu.memory_space<vmem>>, vector<4x128xf32>
    %c24_219 = arith.constant 24 : index
    %c0_220 = arith.constant 0 : index
    %146 = vector.load %arg5[%c24_219, %c0_220] : memref<29x256xf32, #tpu.memory_space<vmem>>, vector<4x128xf32>
    tpu.vector_store %arg5[%c24_219, %c0_220], %145 {strides = array<i32>} : memref<29x256xf32, #tpu.memory_space<vmem>>, vector<4x128xf32>,
    %c0_221 = arith.constant 0 : index
    %c560 = arith.constant 560 : index
    %147 = vector.load %arg4[%c0_221, %c560] : memref<4x768xf32, #tpu.memory_space<vmem>>, vector<4x128xf32>
    %c24_222 = arith.constant 24 : index
    %c128_223 = arith.constant 128 : index
    %148 = vector.load %arg5[%c24_222, %c128_223] : memref<29x256xf32, #tpu.memory_space<vmem>>, vector<4x128xf32>
    tpu.vector_store %arg5[%c24_222, %c128_223], %147 {strides = array<i32>} : memref<29x256xf32, #tpu.memory_space<vmem>>, vector<4x128xf32>,
    %c3 = arith.constant 3 : index
    %c0_224 = arith.constant 0 : index
    %c0_225 = arith.constant 0 : index
    %149 = vector.load %arg2[%c3, %c0_224, %c0_225] : memref<5x4x29xf32, #tpu.memory_space<vmem>>, vector<1x4x29xf32>
    %150 = vector.shape_cast %149 : vector<1x4x29xf32> to vector<4x29xf32>
    %c0_226 = arith.constant 0 : index
    %c0_227 = arith.constant 0 : index
    %151 = vector.load %arg5[%c0_226, %c0_227] : memref<29x256xf32, #tpu.memory_space<vmem>>, vector<29x256xf32>
    %cst_228 = arith.constant dense<0.000000e+00> : vector<4x256xf32>
    %152 = tpu.matmul %150, %151, %cst_228 {dimension_numbers = #tpu.dot_dimension_numbers<[1], [0], [0], [1], [0, 0, 1, 1], [], []>} : vector<4x29xf32>, vector<29x256xf32>, vector<4x256xf32> -> vector<4x256xf32>
    %153 = vector.extract_strided_slice %152 {offsets = [0, 0], sizes = [4, 128], strides = [1, 1]} : vector<4x256xf32> to vector<4x128xf32>
    %c0_229 = arith.constant 0 : index
    %c128_230 = arith.constant 128 : index
    %154 = vector.load %arg4[%c0_229, %c128_230] : memref<4x768xf32, #tpu.memory_space<vmem>>, vector<4x128xf32>
    tpu.vector_store %arg4[%c0_229, %c128_230], %153 {strides = array<i32>} : memref<4x768xf32, #tpu.memory_space<vmem>>, vector<4x128xf32>,
    %155 = vector.extract_strided_slice %152 {offsets = [0, 128], sizes = [4, 128], strides = [1, 1]} : vector<4x256xf32> to vector<4x128xf32>
    %c0_231 = arith.constant 0 : index
    %c512_232 = arith.constant 512 : index
    %156 = vector.load %arg4[%c0_231, %c512_232] : memref<4x768xf32, #tpu.memory_space<vmem>>, vector<4x128xf32>
    tpu.vector_store %arg4[%c0_231, %c512_232], %155 {strides = array<i32>} : memref<4x768xf32, #tpu.memory_space<vmem>>, vector<4x128xf32>,
    %c0_233 = arith.constant 0 : index
    %c32 = arith.constant 32 : index
    %157 = vector.load %arg4[%c0_233, %c32] : memref<4x768xf32, #tpu.memory_space<vmem>>, vector<4x128xf32>
    %c0_234 = arith.constant 0 : index
    %c0_235 = arith.constant 0 : index
    %158 = vector.load %arg5[%c0_234, %c0_235] : memref<29x256xf32, #tpu.memory_space<vmem>>, vector<4x128xf32>
    tpu.vector_store %arg5[%c0_234, %c0_235], %157 {strides = array<i32>} : memref<29x256xf32, #tpu.memory_space<vmem>>, vector<4x128xf32>,
    %c0_236 = arith.constant 0 : index
    %c416 = arith.constant 416 : index
    %159 = vector.load %arg4[%c0_236, %c416] : memref<4x768xf32, #tpu.memory_space<vmem>>, vector<4x128xf32>
    %c0_237 = arith.constant 0 : index
    %c128_238 = arith.constant 128 : index
    %160 = vector.load %arg5[%c0_237, %c128_238] : memref<29x256xf32, #tpu.memory_space<vmem>>, vector<4x128xf32>
    tpu.vector_store %arg5[%c0_237, %c128_238], %159 {strides = array<i32>} : memref<29x256xf32, #tpu.memory_space<vmem>>, vector<4x128xf32>,
    %c0_239 = arith.constant 0 : index
    %c64 = arith.constant 64 : index
    %161 = vector.load %arg4[%c0_239, %c64] : memref<4x768xf32, #tpu.memory_space<vmem>>, vector<4x128xf32>
    %c4_240 = arith.constant 4 : index
    %c0_241 = arith.constant 0 : index
    %162 = vector.load %arg5[%c4_240, %c0_241] : memref<29x256xf32, #tpu.memory_space<vmem>>, vector<4x128xf32>
    tpu.vector_store %arg5[%c4_240, %c0_241], %161 {strides = array<i32>} : memref<29x256xf32, #tpu.memory_space<vmem>>, vector<4x128xf32>,
    %c0_242 = arith.constant 0 : index
    %c448 = arith.constant 448 : index
    %163 = vector.load %arg4[%c0_242, %c448] : memref<4x768xf32, #tpu.memory_space<vmem>>, vector<4x128xf32>
    %c4_243 = arith.constant 4 : index
    %c128_244 = arith.constant 128 : index
    %164 = vector.load %arg5[%c4_243, %c128_244] : memref<29x256xf32, #tpu.memory_space<vmem>>, vector<4x128xf32>
    tpu.vector_store %arg5[%c4_243, %c128_244], %163 {strides = array<i32>} : memref<29x256xf32, #tpu.memory_space<vmem>>, vector<4x128xf32>,
    %c0_245 = arith.constant 0 : index
    %c96_246 = arith.constant 96 : index
    %165 = vector.load %arg4[%c0_245, %c96_246] : memref<4x768xf32, #tpu.memory_space<vmem>>, vector<4x128xf32>
    %c8_247 = arith.constant 8 : index
    %c0_248 = arith.constant 0 : index
    %166 = vector.load %arg5[%c8_247, %c0_248] : memref<29x256xf32, #tpu.memory_space<vmem>>, vector<4x128xf32>
    tpu.vector_store %arg5[%c8_247, %c0_248], %165 {strides = array<i32>} : memref<29x256xf32, #tpu.memory_space<vmem>>, vector<4x128xf32>,
    %c0_249 = arith.constant 0 : index
    %c480_250 = arith.constant 480 : index
    %167 = vector.load %arg4[%c0_249, %c480_250] : memref<4x768xf32, #tpu.memory_space<vmem>>, vector<4x128xf32>
    %c8_251 = arith.constant 8 : index
    %c128_252 = arith.constant 128 : index
    %168 = vector.load %arg5[%c8_251, %c128_252] : memref<29x256xf32, #tpu.memory_space<vmem>>, vector<4x128xf32>
    tpu.vector_store %arg5[%c8_251, %c128_252], %167 {strides = array<i32>} : memref<29x256xf32, #tpu.memory_space<vmem>>, vector<4x128xf32>,
    %c0_253 = arith.constant 0 : index
    %c128_254 = arith.constant 128 : index
    %169 = vector.load %arg4[%c0_253, %c128_254] : memref<4x768xf32, #tpu.memory_space<vmem>>, vector<4x128xf32>
    %c12_255 = arith.constant 12 : index
    %c0_256 = arith.constant 0 : index
    %170 = vector.load %arg5[%c12_255, %c0_256] : memref<29x256xf32, #tpu.memory_space<vmem>>, vector<4x128xf32>
    tpu.vector_store %arg5[%c12_255, %c0_256], %169 {strides = array<i32>} : memref<29x256xf32, #tpu.memory_space<vmem>>, vector<4x128xf32>,
    %c0_257 = arith.constant 0 : index
    %c512_258 = arith.constant 512 : index
    %171 = vector.load %arg4[%c0_257, %c512_258] : memref<4x768xf32, #tpu.memory_space<vmem>>, vector<4x128xf32>
    %c12_259 = arith.constant 12 : index
    %c128_260 = arith.constant 128 : index
    %172 = vector.load %arg5[%c12_259, %c128_260] : memref<29x256xf32, #tpu.memory_space<vmem>>, vector<4x128xf32>
    tpu.vector_store %arg5[%c12_259, %c128_260], %171 {strides = array<i32>} : memref<29x256xf32, #tpu.memory_space<vmem>>, vector<4x128xf32>,
    %c0_261 = arith.constant 0 : index
    %c160_262 = arith.constant 160 : index
    %173 = vector.load %arg4[%c0_261, %c160_262] : memref<4x768xf32, #tpu.memory_space<vmem>>, vector<4x128xf32>
    %c16_263 = arith.constant 16 : index
    %c0_264 = arith.constant 0 : index
    %174 = vector.load %arg5[%c16_263, %c0_264] : memref<29x256xf32, #tpu.memory_space<vmem>>, vector<4x128xf32>
    tpu.vector_store %arg5[%c16_263, %c0_264], %173 {strides = array<i32>} : memref<29x256xf32, #tpu.memory_space<vmem>>, vector<4x128xf32>,
    %c0_265 = arith.constant 0 : index
    %c544_266 = arith.constant 544 : index
    %175 = vector.load %arg4[%c0_265, %c544_266] : memref<4x768xf32, #tpu.memory_space<vmem>>, vector<4x128xf32>
    %c16_267 = arith.constant 16 : index
    %c128_268 = arith.constant 128 : index
    %176 = vector.load %arg5[%c16_267, %c128_268] : memref<29x256xf32, #tpu.memory_space<vmem>>, vector<4x128xf32>
    tpu.vector_store %arg5[%c16_267, %c128_268], %175 {strides = array<i32>} : memref<29x256xf32, #tpu.memory_space<vmem>>, vector<4x128xf32>,
    %c0_269 = arith.constant 0 : index
    %c192 = arith.constant 192 : index
    %177 = vector.load %arg4[%c0_269, %c192] : memref<4x768xf32, #tpu.memory_space<vmem>>, vector<4x128xf32>
    %c20_270 = arith.constant 20 : index
    %c0_271 = arith.constant 0 : index
    %178 = vector.load %arg5[%c20_270, %c0_271] : memref<29x256xf32, #tpu.memory_space<vmem>>, vector<4x128xf32>
    tpu.vector_store %arg5[%c20_270, %c0_271], %177 {strides = array<i32>} : memref<29x256xf32, #tpu.memory_space<vmem>>, vector<4x128xf32>,
    %c0_272 = arith.constant 0 : index
    %c576 = arith.constant 576 : index
    %179 = vector.load %arg4[%c0_272, %c576] : memref<4x768xf32, #tpu.memory_space<vmem>>, vector<4x128xf32>
    %c20_273 = arith.constant 20 : index
    %c128_274 = arith.constant 128 : index
    %180 = vector.load %arg5[%c20_273, %c128_274] : memref<29x256xf32, #tpu.memory_space<vmem>>, vector<4x128xf32>
    tpu.vector_store %arg5[%c20_273, %c128_274], %179 {strides = array<i32>} : memref<29x256xf32, #tpu.memory_space<vmem>>, vector<4x128xf32>,
    %c0_275 = arith.constant 0 : index
    %c224 = arith.constant 224 : index
    %181 = vector.load %arg4[%c0_275, %c224] : memref<4x768xf32, #tpu.memory_space<vmem>>, vector<4x128xf32>
    %c24_276 = arith.constant 24 : index
    %c0_277 = arith.constant 0 : index
    %182 = vector.load %arg5[%c24_276, %c0_277] : memref<29x256xf32, #tpu.memory_space<vmem>>, vector<4x128xf32>
    tpu.vector_store %arg5[%c24_276, %c0_277], %181 {strides = array<i32>} : memref<29x256xf32, #tpu.memory_space<vmem>>, vector<4x128xf32>,
    %c0_278 = arith.constant 0 : index
    %c608 = arith.constant 608 : index
    %183 = vector.load %arg4[%c0_278, %c608] : memref<4x768xf32, #tpu.memory_space<vmem>>, vector<4x128xf32>
    %c24_279 = arith.constant 24 : index
    %c128_280 = arith.constant 128 : index
    %184 = vector.load %arg5[%c24_279, %c128_280] : memref<29x256xf32, #tpu.memory_space<vmem>>, vector<4x128xf32>
    tpu.vector_store %arg5[%c24_279, %c128_280], %183 {strides = array<i32>} : memref<29x256xf32, #tpu.memory_space<vmem>>, vector<4x128xf32>,
    %c4_281 = arith.constant 4 : index
    %c0_282 = arith.constant 0 : index
    %c0_283 = arith.constant 0 : index
    %185 = vector.load %arg2[%c4_281, %c0_282, %c0_283] : memref<5x4x29xf32, #tpu.memory_space<vmem>>, vector<1x4x29xf32>
    %186 = vector.shape_cast %185 : vector<1x4x29xf32> to vector<4x29xf32>
    %c0_284 = arith.constant 0 : index
    %c0_285 = arith.constant 0 : index
    %187 = vector.load %arg5[%c0_284, %c0_285] : memref<29x256xf32, #tpu.memory_space<vmem>>, vector<29x256xf32>
    %cst_286 = arith.constant dense<0.000000e+00> : vector<4x256xf32>
    %188 = tpu.matmul %186, %187, %cst_286 {dimension_numbers = #tpu.dot_dimension_numbers<[1], [0], [0], [1], [0, 0, 1, 1], [], []>} : vector<4x29xf32>, vector<29x256xf32>, vector<4x256xf32> -> vector<4x256xf32>
    %189 = vector.extract_strided_slice %188 {offsets = [0, 0], sizes = [4, 128], strides = [1, 1]} : vector<4x256xf32> to vector<4x128xf32>
    %c0_287 = arith.constant 0 : index
    %c0_288 = arith.constant 0 : index
    %c0_289 = arith.constant 0 : index
    %190 = vector.load %arg1[%c0_287, %c0_288, %c0_289] : memref<2x4x128xf32, #tpu.memory_space<vmem>>, vector<1x4x128xf32>
    %191 = vector.shape_cast %190 : vector<1x4x128xf32> to vector<4x128xf32>
    %192 = arith.addf %189, %191 : vector<4x128xf32>
    %c0_290 = arith.constant 0 : index
    %c0_291 = arith.constant 0 : index
    %c0_292 = arith.constant 0 : index
    %193 = vector.load %arg3[%c0_290, %c0_291, %c0_292] : memref<2x4x128xf32, #tpu.memory_space<vmem>>, vector<1x4x128xf32>
    %194 = vector.shape_cast %193 : vector<1x4x128xf32> to vector<4x128xf32>
    %195 = vector.shape_cast %192 : vector<4x128xf32> to vector<1x4x128xf32>
    tpu.vector_store %arg3[%c0_290, %c0_291, %c0_292], %195 {strides = array<i32>} : memref<2x4x128xf32, #tpu.memory_space<vmem>>, vector<1x4x128xf32>,
    %196 = vector.extract_strided_slice %188 {offsets = [0, 128], sizes = [4, 128], strides = [1, 1]} : vector<4x256xf32> to vector<4x128xf32>
    %c1_293 = arith.constant 1 : index
    %c0_294 = arith.constant 0 : index
    %c0_295 = arith.constant 0 : index
    %197 = vector.load %arg1[%c1_293, %c0_294, %c0_295] : memref<2x4x128xf32, #tpu.memory_space<vmem>>, vector<1x4x128xf32>
    %198 = vector.shape_cast %197 : vector<1x4x128xf32> to vector<4x128xf32>
    %199 = arith.addf %196, %198 : vector<4x128xf32>
    %c1_296 = arith.constant 1 : index
    %c0_297 = arith.constant 0 : index
    %c0_298 = arith.constant 0 : index
    %200 = vector.load %arg3[%c1_296, %c0_297, %c0_298] : memref<2x4x128xf32, #tpu.memory_space<vmem>>, vector<1x4x128xf32>
    %201 = vector.shape_cast %200 : vector<1x4x128xf32> to vector<4x128xf32>
    %202 = vector.shape_cast %199 : vector<4x128xf32> to vector<1x4x128xf32>
    tpu.vector_store %arg3[%c1_296, %c0_297, %c0_298], %202 {strides = array<i32>} : memref<2x4x128xf32, #tpu.memory_space<vmem>>, vector<1x4x128xf32>,
    return
  }
  func.func @transform_0(%arg0: i32) -> (i32, i32, i32) {
    %c0_i32 = arith.constant 0 : i32
    %c0_i32_0 = arith.constant 0 : i32
    %c0_i32_1 = arith.constant 0 : i32
    return %arg0, %c0_i32, %c0_i32_0 : i32, i32, i32
  }
  func.func @transform_1(%arg0: i32) -> (i32, i32, i32) {
    %c0_i32 = arith.constant 0 : i32
    %c0_i32_0 = arith.constant 0 : i32
    %c0_i32_1 = arith.constant 0 : i32
    %c0_i32_2 = arith.constant 0 : i32
    return %c0_i32, %c0_i32_0, %c0_i32_1 : i32, i32, i32
  }
  func.func @transform_2(%arg0: i32) -> (i32, i32, i32) {
    %c0_i32 = arith.constant 0 : i32
    %c0_i32_0 = arith.constant 0 : i32
    %c0_i32_1 = arith.constant 0 : i32
    return %arg0, %c0_i32, %c0_i32_0 : i32, i32, i32
  }
}

</mosaic_0001>

<bundles_post_ra>
// kernel: tpu_custom_call.1
= control target key start
LH: loop header
LB: loop body
LE: loop exit
PB: predicated region body
PF: predicated region fallthrough
CT: control target
= control target key end

     0   :  { %7 = vsyncpa [#allocation5], 0  ;;  %s2204_s0 = inlined_call_operand.hbm [shape: f32[4,4,128], index: 0, kind: input, shape index: {}]   ;;  %s2205_s1 = inlined_call_operand.hbm [shape: f32[5,4,29], index: 1, kind: input, shape index: {}]   ;;  %s2206_s2 = inlined_call_operand.hbm [shape: f32[4,4,128], index: 2, kind: output, shape index: {}]  }
   0x1   :  { %9 = vsyncpa [#allocation5 + $0x1], 0 }
   0x2   :  { %10 = vsyncpa [#allocation8], 0 }
   0x3   :  { %11 = vsyncpa [#allocation6], 0 }
   0x4   :  { %13 = vsyncpa [#allocation6 + $0x1], 0  ;;  %s1814_s9 = smov 0   ;;  %s1816_s10 = smov 0  }
   0x5   :  { %s1818_s11 = smov 0   ;;  %s1820_s12 = smov 0  }
   0x6 LB: > { %s1835_s13 = sadd.s32 4294967295, %s1770_s12   ;;  %s1427_s14 = sadd.s32 4294967294, %s1770_s12   ;;  %s1770_s12 = sphi %s1820_s12, %s2228_s12   ;;  %s1766_s11 = sphi %s1818_s11, %s2227_s11   ;;  %s1762_s10 = sphi %s1816_s10, %s2226_s10   ;;  %s1758_s9 = sphi %s1814_s9, %s2225_s9  }
   0x7   : > { %p39_p0 = scmp.ne.s32.totalorder %s1762_s10, %s1758_s9  ;;  %p2207_p1 = scmp.eq.s32.totalorder %s1835_s13, 0 }
   0x8   : > { %p90_p3 = scmp.eq.s32.totalorder %s1427_s14, 1  ;;  %p1428_p5 = scmp.ge.s32.totalorder %s1770_s12, 1 }
   0x9   : > { %p1844_p4 = por %p2207_p1, %p39_p0  ;;  %p97_p7 = scmp.lt.s32.totalorder %s1770_s12, 3 }
   0xa   : > { %p1849_p6 = por %p90_p3, %p39_p0  ;;  %s1772_s18 = smov [#allocation7]  }
   0xb   : > { %s2210_s15 = scalar_select %p1844_p4, 1, 0 }
   0xc   : > { %s2211_s16 = scalar_select %p1849_p6, 1, 0 }
   0xd   : > { %p1854_p8 = pnand %p1428_p5, %p97_p7  ;;  %s109_s19 = sshll.u32 %s1772_s18, 4  ;;  %s1858_s19 = int_to_ptr.vmem [resolvable:$true] %s109_s19 }
   0xe   : > { %s1870_s21 = sadd.s32 1, %s1770_s12   ;;  %s26_s22 = sadd.s32 1, %s1766_s11 }
   0xf   : > { %s2212_s17 = scalar_select %p1854_p8, 1, 0 }
  0x10   : > { %p1521_p9 = pneg %p1854_p8  ;;  %s23_s23 = ssub.s32 %s1770_s12, %s1870_s21 }
  0x11   : > { %s1642_s26 = scalar_lea.hbm %s2205_s1, 320 }
  0x12   : > { %p1865_p11 = pnand %p1521_p9, %p2207_p1  ;;  %p1643_p12 = scmp.ne.s32.totalorder %s2205_s1, %s1642_s26 }
  0x13   : > { %p1649_p5 = scmp.lt.u32.totalorder %s1642_s26, %s2205_s1 }
  0x14   : > { %p1644_p13 = pneg %p1865_p11 }
  0x16   : > { %p1645_p0 = pnand %p1644_p13, %p1643_p12 }
  0x18   : > { %p1646_p3 = pneg %p1645_p0 }
  0x1a   : > { %p1651_p7 = pnand %p1649_p5, %p1646_p3 }
  0x1c   : > { %1654 = shalt.err (!%p1651_p7)
}
  0x1d   : > { %s1655_s3 = scalar_lea.vmem %s1858_s19, 320  ;;  %p1663_p2 = scmp.lt.s32.totalorder %s1858_s19, %s1858_s19 }
  0x1e   : > { %p1656_p9 = scmp.ne.s32.totalorder %s1858_s19, %s1655_s3  ;;  %p1664_p6 = scmp.lt.s32.totalorder %s1655_s3, %s1655_s3 }
  0x20   : > { %p1658_p10 = pnand %p1656_p9, %p1644_p13  ;;  %p1665_p4 = por %p1664_p6, %p1663_p2 }
  0x22   : > { %p1659_p1 = pneg %p1658_p10 }
  0x24   : > { %p1666_p8 = pnand %p1665_p4, %p1659_p1 }
  0x26   : > { %1669 = shalt.err (!%p1666_p8)
}
  0x27   : > { %s1773_s4 = smov 64   ;;  %s1774_s5 = smov 4  }
  0x28   : > { %1524 = dma.hbm_to_vmem [thread:$0]  (!%p1865_p11), %s2205_s1, 320, %s1858_s19, [#allocation8], %s1773_s4, %s1773_s4, %s1774_s5  }
  0x29   : > { %p24_p1 = scmp.eq.s32.totalorder %s23_s23, 0  ;;  %p33_p2 = scmp.ne.s32.totalorder %s1766_s11, %s1762_s10 }
  0x2a   : > { %p34_p4 = scmp.eq.s32.totalorder %s1770_s12, 0  ;;  %p1534_p6 = scmp.lt.s32.totalorder %s1770_s12, 2 }
  0x2b   : > { %s1904_s8 = scalar_select %p24_p1, %s1766_s11, %s26_s22  }
  0x2c   : > { %p35_p8 = por %p34_p4, %p33_p2  ;;  %p2214_p10 = scmp.eq.s32.totalorder %s1835_s13, 1 }
  0x2d   : > { %s123_s18 = sand.u32 1, %s1766_s11   ;;  %s1461_s20 = sshll.u32 %s1770_s12, 7 }
  0x2e   : > { %p1908_p12 = por %p2214_p10, %p33_p2  ;;  %s1431_s24 = sshll.u32 %s123_s18, 3 }
  0x2f   : > { %s1917_s27 = scalar_lea.hbm %s2204_s0, %s1461_s20  ;;  %s127_s19 = scalar_lea.vmem [#allocation4], %s1431_s24 }
  0x30   : > { %s134_s22 = sshll.u32 %s127_s19, 4  ;;  %p1919_p11 = pnand %p1534_p6, %p35_p8  ;;  %s1923_s22 = int_to_ptr.vmem [resolvable:$true] %s134_s22 }
  0x31   : > { %s1925_s28 = scalar_lea.sflag [#allocation5], %s123_s18  ;;  %s1670_s29 = scalar_lea.hbm %s1917_s27, 128 }
  0x32   : > { %p1671_p13 = scmp.ne.s32.totalorder %s1917_s27, %s1670_s29  ;;  %p1672_p0 = pneg %p1919_p11 }
  0x33   : > { %s1675_s6 = scalar_lea.hbm %s2204_s0, 256  ;;  %p1676_p7 = scmp.lt.u32.totalorder %s1917_s27, %s2204_s0 }
  0x34   : > { %p1673_p3 = pnand %p1672_p0, %p1671_p13  ;;  %p1677_p9 = scmp.lt.u32.totalorder %s1675_s6, %s1670_s29 }
  0x35   : > { %p1679_p2 = scmp.lt.u32.totalorder %s1670_s29, %s1917_s27 }
  0x36   : > { %p1674_p5 = pneg %p1673_p3  ;;  %p1678_p1 = por %p1677_p9, %p1676_p7 }
  0x38   : > { %p1680_p4 = por %p1679_p2, %p1678_p1 }
  0x3a   : > { %p1681_p6 = pnand %p1680_p4, %p1674_p5 }
  0x3c   : > { %1684 = shalt.err (!%p1681_p6)
}
  0x3d   : > { %s1685_s18 = scalar_lea.vmem %s1923_s22, 128  ;;  %s1775_s24 = smov [#allocation4]  }
  0x3e   : > { %p1686_p8 = scmp.ne.s32.totalorder %s1923_s22, %s1685_s18  ;;  %s1690_s25 = sshll.u32 %s1775_s24, 4  ;;  %s1691_s25 = int_to_ptr.vmem [resolvable:$false] %s1690_s25 }
  0x3f   : > { %s1692_s26 = scalar_lea.vmem %s1691_s25, 256  ;;  %p1693_p3 = scmp.lt.s32.totalorder %s1923_s22, %s1691_s25 }
  0x40   : > { %p1688_p10 = pnand %p1686_p8, %p1672_p0  ;;  %p1694_p7 = scmp.lt.s32.totalorder %s1692_s26, %s1685_s18 }
  0x42   : > { %p1689_p13 = pneg %p1688_p10  ;;  %p1695_p9 = por %p1694_p7, %p1693_p3 }
  0x44   : > { %p1696_p1 = pnand %p1695_p9, %p1689_p13 }
  0x46   : > { %1699 = shalt.err (!%p1696_p1)
}
  0x47   : > { %1528 = dma.hbm_to_vmem [thread:$0]  (!%p1919_p11), %s1917_s27, 128, %s1923_s22, %s1925_s28, %s1773_s4, %s1773_s4, %s1774_s5  }
  0x48   : > { %p2217_p0 = scmp.ne.s32.totalorder %s2212_s17, 0 }
  0x49   : > { %s1959_s19 = sand.u32 (!%p2217_p0), 1, %s1762_s10   ;;  %p2218_p5 = scmp.ne.s32.totalorder (!%p2217_p0), %s2210_s15, 0 }
  0x4a   : > { %146 = sbr.rel (%p2217_p0) target bundleno = 2070 (0x816), region = 28  ;;  %s1435_s29 = sshll.u32 (!%p2217_p0), %s1959_s19, 3 }
  0x4b   : > { %s149_s30 = scalar_lea.sflag (!%p2217_p0), [#allocation5], %s1959_s19  ;;  %s1965_s23 = scalar_lea.vmem (!%p2217_p0), [#allocation4], %s1435_s29 }
  0x51   : > { %1745 = dma.done.wait (%p2218_p5), %s149_s30, 128  }
  0x52   : > { %1747 = vsyncadd (%p2218_p5), %s149_s30, 4294967168  ;;  %p2219_p11 = scmp.eq.s32.totalorder %s1835_s13, 0 }
  0x54   : > { %1749 = dma.done.wait (%p2219_p11), [#allocation8], 320   ;;  %p2220_p2 = pmov %p2219_p11 }
  0x55   : > { %v1776_v0 = vmov 0.0   ;;  %v1438_v1 = vld [vmem:[%s1965_s23 + $0x4] sm:$0xf]  ;;  %v190_v2 = vld [vmem:[%s1965_s23] sm:$0xf]  ;;  %s1777_s15 = smov 4   ;;  %v183_v12 = vlaneseq }
  0x56   : > { %1751 = vsyncadd (%p2220_p2), [#allocation8], 4294966976  ;;  %181 = vst [vmem:[#allocation2 + $0xc] sm:$0xf] %v1776_v0  ;;  %415 = vmatprep.mubr.f32.mxu0 %v1776_v0  ;;  %641 = vmatprep.mubr.f32.mxu1 %v1776_v0  ;;  %s1778_s17 = smov 6   ;;  %s1779_s4 = smov 2  }
  0x57   : > { %179 = vst [vmem:[#allocation2] sm:$0xf] %v1776_v0  ;;  %180 = vst [vmem:[#allocation2 + $0x8] sm:$0xf] %v1776_v0  ;;  %vm185_vm0 = vcmp.lt.s32.totalorder %v183_v12, 256  ;;  %v1780_v14 = vmov 1.0  }
  0x58   : > { %182 = vst [vmem:[#allocation2 + $0x14] sm:$0xf] %v1776_v0  ;;  %194 = vst [vmem:[#allocation2 + $0x10] sm:$0xf] %v1438_v1  ;;  %s1781_s5 = smov 126   ;;  %s1782_s27 = smov 124  }
  0x59   : > { %191 = vst [vmem:[#allocation2 + $0x4] sm:$0xf] %v190_v2  ;;  %188 = vst.msk [vmem:[#allocation3 + $0x34] ss:$8 sm:$0x3] %vm185_vm0, %v1780_v14  ;;  %s1783_s22 = smov 122  }
  0x5a   : > { %vm223_vm1 = vcmask 31744   ;;  %vm244_vm2 = vcmask 15360   ;;  %vm202_vm3 = vcmask 48128   ;;  %vm275_vm4 = vcmask 1031168   ;;  %s1785_s28 = smov 8   ;;  %s1786_s3 = smov 12  }
  0x5b   : > { %vm296_vm5 = vcmask 1014784   ;;  %vm317_vm6 = vcmask 998400   ;;  %vm344_vm7 = vcmask 1044480   ;;  %vm1784_vm8 = vmmov 1   ;;  %s1787_s6 = smov 120   ;;  %s1788_s7 = smov 116  }
  0x5c   : > { %vm2000_vm9 = vmpackc.low %vm344_vm7, %vm1784_vm8  ;;  %vm340_vm10 = vcmask 236544   ;;  %vm431_vm11 = vcmask 97280   ;;  %vm452_vm12 = vcmask 64512   ;;  %vm523_vm13 = vcmask 982016   ;;  %s1789_s20 = smov 16   ;;  %s1790_s18 = smov 24  }
  0x5d   : > { %vm544_vm14 = vcmask 949248   ;;  %s1791_s24 = smov 112   ;;  %s1792_s25 = smov 104   ;;  %vm657_vm15 = vcmask 195584   ;;  %vm678_vm0 = vcmask 130048   ;;  %vm1129_vm7 = vcmask 523264  }
  0x5e   : > { %s1793_s26 = smov 32   ;;  %s1794_s30 = smov 48  }
  0x5f   : > { %v227_v3 = vld [vmem:[#allocation2 + $0xc] sm:$0xff] }
  0x60   : > { %232 = vrot.lane.b32.xlu1 %v227_v3, %s1777_s15  ;;  %209 = vrot.lane.b32.xlu0 %v227_v3, %s1778_s17  ;;  %v1600_v4 = vld [vmem:[#allocation2 + $0x10] ss:$0 sps:$4 sm:$0xff]   ;;  %v216_v5 = vld [vmem:[#allocation2] sm:$0xff]  ;;  %v229_v6 = vcombine.low %v227_v3, %v227_v3  ;;  %v250_v8 = vcombine.high %v227_v3, %v227_v3 }
  0x61   : > { %267 = vst [vmem:[#allocation3 + $0x18] sm:$0xf0] %v1600_v4  ;;  %v1601_v7 = vld [vmem:[#allocation2 + $0x4] ss:$0 sps:$4 sm:$0xff]   ;;  %v218_v9 = vcombine.low %v216_v5, %v216_v5  ;;  %v197_v10 = vcombine.high %v216_v5, %v216_v5  ;;  %v279_v11 = vld [vmem:[#allocation2 + $0x10] sm:$0xff] }
  0x62   : > { %262 = vst [vmem:[#allocation3 + $0x10] sm:$0xf0] %v1601_v7  ;;  %v281_v13 = vcombine.high %v279_v11, %v279_v11  ;;  %v302_v15 = vcombine.low %v279_v11, %v279_v11  ;;  %v268_v16 = vld [vmem:[#allocation2 + $0x4] sm:$0xff] }
  0x63   : > { %v270_v17 = vcombine.high %v268_v16, %v268_v16  ;;  %v291_v18 = vcombine.low %v268_v16, %v268_v16 }
  0x64   : > { %251 = vrot.lane.b32.xlu0 %v227_v3, %s1779_s4  ;;  %221 = vrot.lane.b32.xlu1 %v216_v5, %s1777_s15 }
  0x68   : > { %230 = vrot.lane.b32.xlu1 %v229_v6, %s1777_s15  ;;  %198 = vrot.lane.b32.xlu0 %v216_v5, %s1778_s17 }
  0x6c   : > { %253 = vrot.lane.b32.xlu1 %v250_v8, %s1779_s4  ;;  %211 = vrot.lane.b32.xlu0 %v250_v8, %s1778_s17 }
  0x70   : > { %219 = vrot.lane.b32.xlu0 %v218_v9, %s1777_s15  ;;  %200 = vrot.lane.b32.xlu1 %v197_v10, %s1778_s17  ;;  %s1795_s17 = smov 96  }
  0x74   : > { %240 = vrot.lane.b32.xlu0 %v216_v5, %s1779_s4  ;;  %242 = vrot.lane.b32.xlu1 %v197_v10, %s1779_s4  ;;  %v331_v5 = vld [vmem:[#allocation7] sm:$0xf]  ;;  %s1796_s4 = smov 80  }
  0x78   : > { %282 = vrot.lane.b32.xlu0 %v279_v11, %s1781_s5  ;;  %284 = vrot.lane.b32.xlu1 %v281_v13, %s1781_s5 }
  0x7c   : > { %303 = vrot.lane.b32.xlu0 %v302_v15, %s1782_s27  ;;  %305 = vrot.lane.b32.xlu1 %v279_v11, %s1782_s27 }
  0x80   : > { %324 = vrot.lane.b32.xlu0 %v279_v11, %s1783_s22  ;;  %326 = vrot.lane.b32.xlu1 %v281_v13, %s1783_s22 }
  0x84   : > { %271 = vrot.lane.b32.xlu0 %v268_v16, %s1781_s5  ;;  %273 = vrot.lane.b32.xlu1 %v270_v17, %s1781_s5  ;;  %s1797_s5 = smov 64  }
  0x88   : > { %292 = vrot.lane.b32.xlu0 %v291_v18, %s1782_s27  ;;  %294 = vrot.lane.b32.xlu1 %v268_v16, %s1782_s27 }
  0x8c   : > { %313 = vrot.lane.b32.xlu0 %v268_v16, %s1783_s22  ;;  %315 = vrot.lane.b32.xlu1 %v270_v17, %s1783_s22 }
  0xd2   : > { %v233_v19 = vpop.permute.xlu1 %232  ;;  %v210_v20 = vpop.permute.xlu0 %209 }
  0xd6   : > { %v252_v21 = vpop.permute.xlu0 %251  ;;  %v222_v22 = vpop.permute.xlu1 %221 }
  0xda   : > { %v231_v23 = vpop.permute.xlu1 %230  ;;  %v199_v24 = vpop.permute.xlu0 %198 }
  0xdb   : > { %v234_v25 = vsel %vm223_vm1, %v231_v23, %v233_v19 }
  0xdc   : > { %236 = vst [vmem:[#allocation3 + $0x8] sm:$0xf0] %v234_v25 }
  0xde   : > { %v254_v26 = vpop.permute.xlu1 %253  ;;  %v212_v27 = vpop.permute.xlu0 %211 }
  0xdf   : > { %v255_v28 = vsel %vm244_vm2, %v252_v21, %v254_v26  ;;  %v213_v29 = vsel %vm202_vm3, %v210_v20, %v212_v27 }
  0xe0   : > { %257 = vst [vmem:[#allocation3 + $0x18] sm:$0xf] %v255_v28  ;;  %215 = vst [vmem:[#allocation3 + $0x8] sm:$0xf] %v213_v29 }
  0xe2   : > { %v220_v30 = vpop.permute.xlu0 %219  ;;  %v201_v31 = vpop.permute.xlu1 %200 }
  0xe3   : > { %v224_v32 = vsel %vm223_vm1, %v220_v30, %v222_v22  ;;  %v203_v33 = vsel %vm202_vm3, %v199_v24, %v201_v31  ;;  %vm883_vm3 = vcmask 392192  }
  0xe4   : > { %226 = vst [vmem:[#allocation3] sm:$0xf0] %v224_v32  ;;  %205 = vst [vmem:[#allocation3] sm:$0xf] %v203_v33 }
  0xe6   : > { %v241_v34 = vpop.permute.xlu0 %240  ;;  %v243_v35 = vpop.permute.xlu1 %242 }
  0xe7   : > { %v245_v36 = vsel %vm244_vm2, %v241_v34, %v243_v35  ;;  %v333_v37 = vld [vmem:[#allocation3 + $0x8] sm:$0xff]  ;;  %v335_v38 = vld [vmem:[#allocation3 + $0x18] sm:$0xff]  ;;  %vm770_vm2 = vcmask 850944  }
  0xe8   : > { %247 = vst [vmem:[#allocation3 + $0x10] sm:$0xf] %v245_v36  ;;  %v1463_v39 = vpack.c.bf16 %v335_v38, %v333_v37 }
  0xea   : > { %1464 = vmatprep.subr.bf16.mxu0 %v1463_v39  ;;  %v283_v40 = vpop.permute.xlu0 %282  ;;  %v285_v41 = vpop.permute.xlu1 %284 }
  0xeb   : > { %v286_v42 = vsel %vm275_vm4, %v283_v40, %v285_v41  ;;  %v332_v46 = vld [vmem:[#allocation3] sm:$0xff] }
  0xec   : > { %288 = vst [vmem:[#allocation3 + $0x28] sm:$0xf] %v286_v42 }
  0xee   : > { %v304_v43 = vpop.permute.xlu0 %303  ;;  %v306_v44 = vpop.permute.xlu1 %305 }
  0xef   : > { %v307_v45 = vsel %vm296_vm5, %v304_v43, %v306_v44  ;;  %v334_v47 = vld [vmem:[#allocation3 + $0x10] sm:$0xff] }
  0xf0   : > { %309 = vst [vmem:[#allocation3 + $0x28] sm:$0xf0] %v307_v45  ;;  %v1465_v48 = vpack.c.bf16 %v334_v47, %v332_v46 }
  0xf2   : > { %v325_v49 = vpop.permute.xlu0 %324  ;;  %1466 = vmatpush1.bf16.msra.mxu0 %v1465_v48  ;;  %v327_v50 = vpop.permute.xlu1 %326 }
  0xf3   : > { %v328_v51 = vsel %vm317_vm6, %v325_v49, %v327_v50 }
  0xf4   : > { %330 = vst [vmem:[#allocation3 + $0x38] sm:$0xf] %v328_v51 }
  0xf6   : > { %v272_v52 = vpop.permute.xlu0 %271  ;;  %v274_v53 = vpop.permute.xlu1 %273 }
  0xf7   : > { %v276_v54 = vsel %vm275_vm4, %v272_v52, %v274_v53  ;;  %v337_v58 = vld [vmem:[#allocation3 + $0x28] sm:$0xff]  ;;  %vm904_vm4 = vcmask 261120  }
  0xf8   : > { %278 = vst [vmem:[#allocation3 + $0x20] sm:$0xf] %v276_v54 }
  0xfa   : > { %v293_v55 = vpop.permute.xlu0 %292  ;;  %v295_v56 = vpop.permute.xlu1 %294 }
  0xfb   : > { %v297_v57 = vsel %vm296_vm5, %v293_v55, %v295_v56  ;;  %v339_v59 = vld [vmem:[#allocation3 + $0x38] sm:$0x1f] }
  0xfc   : > { %299 = vst [vmem:[#allocation3 + $0x20] sm:$0xf0] %v297_v57  ;;  %v1467_v61 = vpack.c.bf16 %v339_v59, %v337_v58 }
  0xfe   : > { %v314_v62 = vpop.permute.xlu0 %313  ;;  %1469 = vmatprep.subr.msk.bf16.mxu0 %vm2000_vm9, %v1467_v61  ;;  %v316_v63 = vpop.permute.xlu1 %315 }
  0xff   : > { %v318_v1 = vsel %vm317_vm6, %v314_v62, %v316_v63  ;;  %vm996_vm6 = vcmask 654336  }
 0x100   : > { %320 = vst [vmem:[#allocation3 + $0x30] sm:$0xf] %v318_v1 }
 0x103   : > { %v336_v2 = vld [vmem:[#allocation3 + $0x20] sm:$0xff] }
 0x107   : > { %v338_v3 = vld [vmem:[#allocation3 + $0x30] sm:$0x1f] }
 0x108   : > { %v1470_v4 = vpack.c.bf16 %v338_v3, %v336_v2 }
 0x10a   : > { %1472 = vmatpush1.bf16.msk.msra.mxu0 %vm2000_vm9, %v1470_v4 }
 0x10d   : > { %1441 = vmatmul.mubr.msk.f32.vlgmr.msra.gmra.mrb[0].mxu0 %vm340_vm10, %v331_v5 }
 0x10e   : > { %867 = vmatprep.mubr.f32.mxu0 %v1776_v0 }
 0x1e0   : > { %v417_v6 = vpop.f32.mrb[0].mxu0 }
 0x1e1   : > { %422 = vst [vmem:[#allocation2 + $0x4] sm:$0xf] %v417_v6  ;;  %v419_v7 = vpop.f32.mrb[1].mxu0 }
 0x1e2   : > { %423 = vst [vmem:[#allocation2 + $0x10] sm:$0xf] %v419_v7 }
 0x1e8   : > { %v445_v8 = vld [vmem:[#allocation2] sm:$0xff] }
 0x1e9   : > { %450 = vrot.lane.b32.xlu1 %v445_v8, %s1785_s28  ;;  %427 = vrot.lane.b32.xlu0 %v445_v8, %s1786_s3  ;;  %v1610_v9 = vld [vmem:[#allocation2 + $0x10] ss:$0 sps:$4 sm:$0xff]   ;;  %v1611_v10 = vld [vmem:[#allocation2 + $0x4] ss:$0 sps:$4 sm:$0xff]   ;;  %v426_v14 = vcombine.high %v445_v8, %v445_v8  ;;  %v447_v16 = vcombine.low %v445_v8, %v445_v8 }
 0x1ea   : > { %v516_v11 = vld [vmem:[#allocation2 + $0x4] sm:$0xff]  ;;  %495 = vst [vmem:[#allocation3 + $0x18] sm:$0xf0] %v1610_v9  ;;  %490 = vst [vmem:[#allocation3 + $0x10] sm:$0xf0] %v1611_v10  ;;  %v456_v12 = vld [vmem:[#allocation2 + $0xc] sm:$0xff] }
 0x1eb   : > { %v527_v13 = vld [vmem:[#allocation2 + $0x10] sm:$0xff]  ;;  %v498_v15 = vcombine.high %v516_v11, %v516_v11  ;;  %v437_v17 = vcombine.high %v456_v12, %v456_v12  ;;  %v518_v18 = vcombine.low %v516_v11, %v516_v11  ;;  %v458_v19 = vcombine.low %v456_v12, %v456_v12 }
 0x1ec   : > { %v508_v20 = vcombine.high %v527_v13, %v527_v13  ;;  %v529_v21 = vcombine.low %v527_v13, %v527_v13 }
 0x1ed   : > { %521 = vrot.lane.b32.xlu1 %v516_v11, %s1787_s6  ;;  %469 = vrot.lane.b32.xlu0 %v445_v8, %s1777_s15  ;;  %v559_v8 = vld [vmem:[#allocation7 + $0x4] sm:$0xf] }
 0x1f1   : > { %499 = vrot.lane.b32.xlu0 %v516_v11, %s1782_s27  ;;  %461 = vrot.lane.b32.xlu1 %v456_v12, %s1785_s28 }
 0x1f5   : > { %532 = vrot.lane.b32.xlu1 %v527_v13, %s1787_s6  ;;  %438 = vrot.lane.b32.xlu0 %v456_v12, %s1786_s3 }
 0x1f9   : > { %429 = vrot.lane.b32.xlu1 %v426_v14, %s1786_s3  ;;  %479 = vrot.lane.b32.xlu0 %v456_v12, %s1777_s15 }
 0x1fd   : > { %471 = vrot.lane.b32.xlu1 %v426_v14, %s1777_s15  ;;  %509 = vrot.lane.b32.xlu0 %v527_v13, %s1782_s27 }
 0x201   : > { %501 = vrot.lane.b32.xlu1 %v498_v15, %s1782_s27  ;;  %551 = vrot.lane.b32.xlu0 %v527_v13, %s1788_s7 }
 0x205   : > { %448 = vrot.lane.b32.xlu0 %v447_v16, %s1785_s28  ;;  %440 = vrot.lane.b32.xlu1 %v437_v17, %s1786_s3 }
 0x209   : > { %519 = vrot.lane.b32.xlu0 %v518_v18, %s1787_s6  ;;  %481 = vrot.lane.b32.xlu1 %v437_v17, %s1777_s15 }
 0x20d   : > { %459 = vrot.lane.b32.xlu0 %v458_v19, %s1785_s28  ;;  %511 = vrot.lane.b32.xlu1 %v508_v20, %s1782_s27  ;;  %s176_s27 = scalar_lea.vmem [#allocation9], %s1435_s29  ;;  %s1331_s29 = scalar_lea.sflag [#allocation6], %s1959_s19 }
 0x20e   : > { %s1344_s22 = sshll.u32 %s176_s27, 4  ;;  %s2152_s22 = int_to_ptr.vmem [resolvable:$true] %s1344_s22 }
 0x211   : > { %530 = vrot.lane.b32.xlu0 %v529_v21, %s1787_s6  ;;  %553 = vrot.lane.b32.xlu1 %v508_v20, %s1788_s7 }
 0x215   : > { %540 = vrot.lane.b32.xlu0 %v516_v11, %s1788_s7  ;;  %542 = vrot.lane.b32.xlu1 %v498_v15, %s1788_s7 }
 0x25b   : > { %v451_v22 = vpop.permute.xlu1 %450  ;;  %v428_v23 = vpop.permute.xlu0 %427 }
 0x25f   : > { %v522_v24 = vpop.permute.xlu1 %521  ;;  %v470_v25 = vpop.permute.xlu0 %469 }
 0x263   : > { %v500_v26 = vpop.permute.xlu0 %499  ;;  %v462_v27 = vpop.permute.xlu1 %461 }
 0x267   : > { %v533_v28 = vpop.permute.xlu1 %532  ;;  %v439_v29 = vpop.permute.xlu0 %438 }
 0x26b   : > { %v430_v30 = vpop.permute.xlu1 %429  ;;  %v480_v31 = vpop.permute.xlu0 %479 }
 0x26c   : > { %v432_v32 = vsel %vm431_vm11, %v428_v23, %v430_v30 }
 0x26d   : > { %434 = vst [vmem:[#allocation3] sm:$0xf] %v432_v32 }
 0x26f   : > { %v472_v33 = vpop.permute.xlu1 %471  ;;  %v510_v34 = vpop.permute.xlu0 %509 }
 0x270   : > { %v473_v35 = vsel %vm223_vm1, %v470_v25, %v472_v33 }
 0x271   : > { %475 = vst [vmem:[#allocation3 + $0x10] sm:$0xf] %v473_v35 }
 0x273   : > { %v502_v36 = vpop.permute.xlu1 %501  ;;  %v552_v37 = vpop.permute.xlu0 %551 }
 0x274   : > { %v503_v38 = vsel %vm296_vm5, %v500_v26, %v502_v36 }
 0x275   : > { %505 = vst [vmem:[#allocation3 + $0x20] sm:$0xf] %v503_v38 }
 0x277   : > { %v449_v39 = vpop.permute.xlu0 %448  ;;  %v441_v40 = vpop.permute.xlu1 %440 }
 0x278   : > { %v453_v41 = vsel %vm452_vm12, %v449_v39, %v451_v22  ;;  %v442_v42 = vsel %vm431_vm11, %v439_v29, %v441_v40  ;;  %v562_v63 = vld [vmem:[#allocation3 + $0x10] sm:$0xff] }
 0x279   : > { %455 = vst [vmem:[#allocation3] sm:$0xf0] %v453_v41  ;;  %444 = vst [vmem:[#allocation3 + $0x8] sm:$0xf] %v442_v42 }
 0x27b   : > { %v520_v43 = vpop.permute.xlu0 %519  ;;  %v482_v44 = vpop.permute.xlu1 %481 }
 0x27c   : > { %v524_v45 = vsel %vm523_vm13, %v520_v43, %v522_v24  ;;  %v483_v46 = vsel %vm223_vm1, %v480_v31, %v482_v44  ;;  %vm749_vm1 = vcmask 916480  }
 0x27d   : > { %526 = vst [vmem:[#allocation3 + $0x20] sm:$0xf0] %v524_v45  ;;  %485 = vst [vmem:[#allocation3 + $0x18] sm:$0xf] %v483_v46 }
 0x27f   : > { %v460_v47 = vpop.permute.xlu0 %459  ;;  %v512_v48 = vpop.permute.xlu1 %511 }
 0x280   : > { %v463_v49 = vsel %vm452_vm12, %v460_v47, %v462_v27  ;;  %v513_v50 = vsel %vm296_vm5, %v510_v34, %v512_v48  ;;  %v560_v57 = vld [vmem:[#allocation3] sm:$0xff]  ;;  %vm975_vm5 = vcmask 785408  }
 0x281   : > { %465 = vst [vmem:[#allocation3 + $0x8] sm:$0xf0] %v463_v49  ;;  %515 = vst [vmem:[#allocation3 + $0x28] sm:$0xf] %v513_v50  ;;  %v1475_v1 = vpack.c.bf16 %v562_v63, %v560_v57 }
 0x283   : > { %v531_v51 = vpop.permute.xlu0 %530  ;;  %v554_v52 = vpop.permute.xlu1 %553 }
 0x284   : > { %v534_v53 = vsel %vm523_vm13, %v531_v51, %v533_v28  ;;  %v555_v54 = vsel %vm544_vm14, %v552_v37, %v554_v52  ;;  %v563_v61 = vld [vmem:[#allocation3 + $0x18] sm:$0xff]  ;;  %v564_v5 = vld [vmem:[#allocation3 + $0x20] sm:$0xff] }
 0x285   : > { %536 = vst [vmem:[#allocation3 + $0x28] sm:$0xf0] %v534_v53  ;;  %557 = vst [vmem:[#allocation3 + $0x38] sm:$0xf] %v555_v54 }
 0x287   : > { %v541_v55 = vpop.permute.xlu0 %540  ;;  %v543_v56 = vpop.permute.xlu1 %542 }
 0x288   : > { %v545_v58 = vsel %vm544_vm14, %v541_v55, %v543_v56  ;;  %v561_v59 = vld [vmem:[#allocation3 + $0x8] sm:$0xff] }
 0x289   : > { %547 = vst [vmem:[#allocation3 + $0x30] sm:$0xf] %v545_v58  ;;  %v1473_v62 = vpack.c.bf16 %v563_v61, %v561_v59 }
 0x28b   : > { %1474 = vmatprep.subr.bf16.mxu1 %v1473_v62 }
 0x28c   : > { %1476 = vmatpush1.bf16.msra.mxu1 %v1475_v1  ;;  %v565_v2 = vld [vmem:[#allocation3 + $0x28] sm:$0xff]  ;;  %v567_v3 = vld [vmem:[#allocation3 + $0x38] sm:$0x1f] }
 0x28d   : > { %v1477_v4 = vpack.c.bf16 %v567_v3, %v565_v2 }
 0x28f   : > { %1479 = vmatprep.subr.msk.bf16.mxu1 %vm2000_vm9, %v1477_v4 }
 0x290   : > { %v566_v6 = vld [vmem:[#allocation3 + $0x30] sm:$0x1f] }
 0x291   : > { %v1480_v7 = vpack.c.bf16 %v566_v6, %v564_v5 }
 0x293   : > { %1482 = vmatpush1.bf16.msk.msra.mxu1 %vm2000_vm9, %v1480_v7 }
 0x296   : > { %1444 = vmatmul.mubr.msk.f32.vlgmr.msra.gmra.mrb[0].mxu1 %vm340_vm10, %v559_v8 }
 0x297   : > { %1093 = vmatprep.mubr.f32.mxu1 %v1776_v0 }
 0x369   : > { %v643_v9 = vpop.f32.mrb[0].mxu1 }
 0x36a   : > { %648 = vst [vmem:[#allocation2 + $0x4] sm:$0xf] %v643_v9  ;;  %v645_v10 = vpop.f32.mrb[1].mxu1 }
 0x36b   : > { %649 = vst [vmem:[#allocation2 + $0x10] sm:$0xf] %v645_v10 }
 0x371   : > { %v671_v11 = vld [vmem:[#allocation2] sm:$0xff] }
 0x372   : > { %676 = vrot.lane.b32.xlu1 %v671_v11, %s1789_s20  ;;  %653 = vrot.lane.b32.xlu0 %v671_v11, %s1790_s18  ;;  %v1620_v12 = vld [vmem:[#allocation2 + $0x10] ss:$0 sps:$4 sm:$0xff]   ;;  %v1621_v13 = vld [vmem:[#allocation2 + $0x4] ss:$0 sps:$4 sm:$0xff]   ;;  %v652_v17 = vcombine.high %v671_v11, %v671_v11  ;;  %v673_v19 = vcombine.low %v671_v11, %v671_v11 }
 0x373   : > { %v742_v14 = vld [vmem:[#allocation2 + $0x4] sm:$0xff]  ;;  %721 = vst [vmem:[#allocation3 + $0x18] sm:$0xf0] %v1620_v12  ;;  %716 = vst [vmem:[#allocation3 + $0x10] sm:$0xf0] %v1621_v13  ;;  %v682_v15 = vld [vmem:[#allocation2 + $0xc] sm:$0xff] }
 0x374   : > { %v753_v16 = vld [vmem:[#allocation2 + $0x10] sm:$0xff]  ;;  %v724_v18 = vcombine.high %v742_v14, %v742_v14  ;;  %v663_v20 = vcombine.high %v682_v15, %v682_v15  ;;  %v744_v21 = vcombine.low %v742_v14, %v742_v14  ;;  %v684_v22 = vcombine.low %v682_v15, %v682_v15 }
 0x375   : > { %v734_v23 = vcombine.high %v753_v16, %v753_v16  ;;  %v755_v24 = vcombine.low %v753_v16, %v753_v16 }
 0x376   : > { %747 = vrot.lane.b32.xlu1 %v742_v14, %s1791_s24  ;;  %695 = vrot.lane.b32.xlu0 %v671_v11, %s1785_s28  ;;  %v785_v11 = vld [vmem:[#allocation7 + $0x8] sm:$0xf] }
 0x37a   : > { %725 = vrot.lane.b32.xlu0 %v742_v14, %s1787_s6  ;;  %687 = vrot.lane.b32.xlu1 %v682_v15, %s1789_s20 }
 0x37e   : > { %758 = vrot.lane.b32.xlu1 %v753_v16, %s1791_s24  ;;  %664 = vrot.lane.b32.xlu0 %v682_v15, %s1790_s18 }
 0x382   : > { %655 = vrot.lane.b32.xlu1 %v652_v17, %s1790_s18  ;;  %705 = vrot.lane.b32.xlu0 %v682_v15, %s1785_s28 }
 0x386   : > { %697 = vrot.lane.b32.xlu1 %v652_v17, %s1785_s28  ;;  %735 = vrot.lane.b32.xlu0 %v753_v16, %s1787_s6 }
 0x38a   : > { %727 = vrot.lane.b32.xlu1 %v724_v18, %s1787_s6  ;;  %777 = vrot.lane.b32.xlu0 %v753_v16, %s1792_s25 }
 0x38e   : > { %674 = vrot.lane.b32.xlu0 %v673_v19, %s1789_s20  ;;  %666 = vrot.lane.b32.xlu1 %v663_v20, %s1790_s18 }
 0x392   : > { %745 = vrot.lane.b32.xlu0 %v744_v21, %s1791_s24  ;;  %707 = vrot.lane.b32.xlu1 %v663_v20, %s1785_s28  ;;  %s1462_s28 = sshll.u32 %s1835_s13, 7  ;;  %s1798_s13 = smov [#allocation9]  }
 0x393   : > { %s2157_s7 = scalar_lea.hbm %s2206_s2, %s1462_s28 }
 0x396   : > { %685 = vrot.lane.b32.xlu0 %v684_v22, %s1789_s20  ;;  %737 = vrot.lane.b32.xlu1 %v734_v23, %s1787_s6 }
 0x39a   : > { %756 = vrot.lane.b32.xlu0 %v755_v24, %s1791_s24  ;;  %779 = vrot.lane.b32.xlu1 %v734_v23, %s1792_s25 }
 0x39e   : > { %766 = vrot.lane.b32.xlu0 %v742_v14, %s1792_s25  ;;  %768 = vrot.lane.b32.xlu1 %v724_v18, %s1792_s25 }
 0x3e4   : > { %v677_v25 = vpop.permute.xlu1 %676  ;;  %v654_v26 = vpop.permute.xlu0 %653 }
 0x3e8   : > { %v748_v27 = vpop.permute.xlu1 %747  ;;  %v696_v28 = vpop.permute.xlu0 %695 }
 0x3ec   : > { %v726_v29 = vpop.permute.xlu0 %725  ;;  %v688_v30 = vpop.permute.xlu1 %687 }
 0x3f0   : > { %v759_v31 = vpop.permute.xlu1 %758  ;;  %v665_v32 = vpop.permute.xlu0 %664 }
 0x3f4   : > { %v656_v33 = vpop.permute.xlu1 %655  ;;  %v706_v34 = vpop.permute.xlu0 %705 }
 0x3f5   : > { %v658_v35 = vsel %vm657_vm15, %v654_v26, %v656_v33 }
 0x3f6   : > { %660 = vst [vmem:[#allocation3] sm:$0xf] %v658_v35 }
 0x3f8   : > { %v698_v36 = vpop.permute.xlu1 %697  ;;  %v736_v37 = vpop.permute.xlu0 %735 }
 0x3f9   : > { %v699_v38 = vsel %vm452_vm12, %v696_v28, %v698_v36 }
 0x3fa   : > { %701 = vst [vmem:[#allocation3 + $0x10] sm:$0xf] %v699_v38 }
 0x3fc   : > { %v728_v39 = vpop.permute.xlu1 %727  ;;  %v778_v40 = vpop.permute.xlu0 %777 }
 0x3fd   : > { %v729_v41 = vsel %vm523_vm13, %v726_v29, %v728_v39 }
 0x3fe   : > { %731 = vst [vmem:[#allocation3 + $0x20] sm:$0xf] %v729_v41 }
 0x400   : > { %v675_v42 = vpop.permute.xlu0 %674  ;;  %v667_v43 = vpop.permute.xlu1 %666 }
 0x401   : > { %v679_v44 = vsel %vm678_vm0, %v675_v42, %v677_v25  ;;  %v668_v45 = vsel %vm657_vm15, %v665_v32, %v667_v43  ;;  %v788_v3 = vld [vmem:[#allocation3 + $0x10] sm:$0xff] }
 0x402   : > { %681 = vst [vmem:[#allocation3] sm:$0xf0] %v679_v44  ;;  %670 = vst [vmem:[#allocation3 + $0x8] sm:$0xf] %v668_v45 }
 0x404   : > { %v746_v46 = vpop.permute.xlu0 %745  ;;  %v708_v47 = vpop.permute.xlu1 %707 }
 0x405   : > { %v750_v48 = vsel %vm749_vm1, %v746_v46, %v748_v27  ;;  %v709_v49 = vsel %vm452_vm12, %v706_v34, %v708_v47 }
 0x406   : > { %752 = vst [vmem:[#allocation3 + $0x20] sm:$0xf0] %v750_v48  ;;  %711 = vst [vmem:[#allocation3 + $0x18] sm:$0xf] %v709_v49 }
 0x408   : > { %v686_v50 = vpop.permute.xlu0 %685  ;;  %v738_v51 = vpop.permute.xlu1 %737 }
 0x409   : > { %v689_v52 = vsel %vm678_vm0, %v686_v50, %v688_v30  ;;  %v739_v53 = vsel %vm523_vm13, %v736_v37, %v738_v51  ;;  %v786_v61 = vld [vmem:[#allocation3] sm:$0xff] }
 0x40a   : > { %691 = vst [vmem:[#allocation3 + $0x8] sm:$0xf0] %v689_v52  ;;  %741 = vst [vmem:[#allocation3 + $0x28] sm:$0xf] %v739_v53  ;;  %v1485_v4 = vpack.c.bf16 %v788_v3, %v786_v61 }
 0x40c   : > { %v757_v54 = vpop.permute.xlu0 %756  ;;  %v780_v55 = vpop.permute.xlu1 %779 }
 0x40d   : > { %v760_v56 = vsel %vm749_vm1, %v757_v54, %v759_v31  ;;  %v781_v57 = vsel %vm770_vm2, %v778_v40, %v780_v55  ;;  %v789_v1 = vld [vmem:[#allocation3 + $0x18] sm:$0xff]  ;;  %v790_v8 = vld [vmem:[#allocation3 + $0x20] sm:$0xff] }
 0x40e   : > { %762 = vst [vmem:[#allocation3 + $0x28] sm:$0xf0] %v760_v56  ;;  %783 = vst [vmem:[#allocation3 + $0x38] sm:$0xf] %v781_v57 }
 0x410   : > { %v767_v58 = vpop.permute.xlu0 %766  ;;  %v769_v59 = vpop.permute.xlu1 %768 }
 0x411   : > { %v771_v62 = vsel %vm770_vm2, %v767_v58, %v769_v59  ;;  %v787_v63 = vld [vmem:[#allocation3 + $0x8] sm:$0xff] }
 0x412   : > { %773 = vst [vmem:[#allocation3 + $0x30] sm:$0xf] %v771_v62  ;;  %v1483_v2 = vpack.c.bf16 %v789_v1, %v787_v63 }
 0x414   : > { %1484 = vmatprep.subr.bf16.mxu0 %v1483_v2 }
 0x415   : > { %1486 = vmatpush1.bf16.msra.mxu0 %v1485_v4  ;;  %v791_v5 = vld [vmem:[#allocation3 + $0x28] sm:$0xff]  ;;  %v793_v6 = vld [vmem:[#allocation3 + $0x38] sm:$0x1f] }
 0x416   : > { %v1487_v7 = vpack.c.bf16 %v793_v6, %v791_v5 }
 0x418   : > { %1489 = vmatprep.subr.msk.bf16.mxu0 %vm2000_vm9, %v1487_v7 }
 0x419   : > { %v792_v9 = vld [vmem:[#allocation3 + $0x30] sm:$0x1f] }
 0x41a   : > { %v1490_v10 = vpack.c.bf16 %v792_v9, %v790_v8 }
 0x41c   : > { %1492 = vmatpush1.bf16.msk.msra.mxu0 %vm2000_vm9, %v1490_v10 }
 0x41f   : > { %1447 = vmatmul.mubr.msk.f32.vlgmr.msra.gmra.mrb[2].mxu0 %vm340_vm10, %v785_v11 }
 0x420   : > { %1316 = vmatprep.mubr.f32.mxu0 %v1776_v0 }
 0x4f2   : > { %v869_v12 = vpop.f32.mrb[2].mxu0 }
 0x4f3   : > { %874 = vst [vmem:[#allocation2 + $0x4] sm:$0xf] %v869_v12  ;;  %v871_v13 = vpop.f32.mrb[3].mxu0 }
 0x4f4   : > { %875 = vst [vmem:[#allocation2 + $0x10] sm:$0xf] %v871_v13  ;;  %v1011_v13 = vld [vmem:[#allocation7 + $0xc] sm:$0xf] }
 0x4fa   : > { %v897_v14 = vld [vmem:[#allocation2] sm:$0xff] }
 0x4fb   : > { %902 = vrot.lane.b32.xlu1 %v897_v14, %s1793_s26  ;;  %879 = vrot.lane.b32.xlu0 %v897_v14, %s1794_s30  ;;  %v1630_v15 = vld [vmem:[#allocation2 + $0x10] ss:$0 sps:$4 sm:$0xff]   ;;  %v1631_v16 = vld [vmem:[#allocation2 + $0x4] ss:$0 sps:$4 sm:$0xff]   ;;  %v878_v19 = vcombine.high %v897_v14, %v897_v14  ;;  %v899_v21 = vcombine.low %v897_v14, %v897_v14 }
 0x4fc   : > { %v968_v17 = vld [vmem:[#allocation2 + $0x4] sm:$0xff]  ;;  %947 = vst [vmem:[#allocation3 + $0x18] sm:$0xf0] %v1630_v15  ;;  %942 = vst [vmem:[#allocation3 + $0x10] sm:$0xf0] %v1631_v16  ;;  %v908_v0 = vld [vmem:[#allocation2 + $0xc] sm:$0xff] }
 0x4fd   : > { %v979_v18 = vld [vmem:[#allocation2 + $0x10] sm:$0xff]  ;;  %v950_v20 = vcombine.high %v968_v17, %v968_v17  ;;  %v889_v22 = vcombine.high %v908_v0, %v908_v0  ;;  %v970_v23 = vcombine.low %v968_v17, %v968_v17  ;;  %v910_v24 = vcombine.low %v908_v0, %v908_v0 }
 0x4fe   : > { %v960_v25 = vcombine.high %v979_v18, %v979_v18  ;;  %v981_v26 = vcombine.low %v979_v18, %v979_v18 }
 0x4ff   : > { %973 = vrot.lane.b32.xlu1 %v968_v17, %s1795_s17  ;;  %921 = vrot.lane.b32.xlu0 %v897_v14, %s1789_s20 }
 0x503   : > { %951 = vrot.lane.b32.xlu0 %v968_v17, %s1791_s24  ;;  %913 = vrot.lane.b32.xlu1 %v908_v0, %s1793_s26 }
 0x507   : > { %984 = vrot.lane.b32.xlu1 %v979_v18, %s1795_s17  ;;  %890 = vrot.lane.b32.xlu0 %v908_v0, %s1794_s30 }
 0x50b   : > { %881 = vrot.lane.b32.xlu1 %v878_v19, %s1794_s30  ;;  %931 = vrot.lane.b32.xlu0 %v908_v0, %s1789_s20 }
 0x50f   : > { %923 = vrot.lane.b32.xlu1 %v878_v19, %s1789_s20  ;;  %961 = vrot.lane.b32.xlu0 %v979_v18, %s1791_s24 }
 0x513   : > { %953 = vrot.lane.b32.xlu1 %v950_v20, %s1791_s24  ;;  %1003 = vrot.lane.b32.xlu0 %v979_v18, %s1796_s4 }
 0x517   : > { %900 = vrot.lane.b32.xlu0 %v899_v21, %s1793_s26  ;;  %892 = vrot.lane.b32.xlu1 %v889_v22, %s1794_s30 }
 0x51b   : > { %971 = vrot.lane.b32.xlu0 %v970_v23, %s1795_s17  ;;  %933 = vrot.lane.b32.xlu1 %v889_v22, %s1789_s20  ;;  %s1700_s20 = scalar_lea.vmem %s2152_s22, 128 }
 0x51c   : > { %p1701_p4 = scmp.ne.s32.totalorder %s2152_s22, %s1700_s20 }
 0x51e   : > { %p1702_p6 = pnand %p1701_p4, %p1908_p12 }
 0x51f   : > { %911 = vrot.lane.b32.xlu0 %v910_v24, %s1793_s26  ;;  %963 = vrot.lane.b32.xlu1 %v960_v25, %s1791_s24 }
 0x520   : > { %p1703_p8 = pneg %p1702_p6 }
 0x523   : > { %982 = vrot.lane.b32.xlu0 %v981_v26, %s1795_s17  ;;  %1005 = vrot.lane.b32.xlu1 %v960_v25, %s1796_s4 }
 0x527   : > { %992 = vrot.lane.b32.xlu0 %v968_v17, %s1796_s4  ;;  %994 = vrot.lane.b32.xlu1 %v950_v20, %s1796_s4 }
 0x56d   : > { %v903_v27 = vpop.permute.xlu1 %902  ;;  %v880_v28 = vpop.permute.xlu0 %879 }
 0x571   : > { %v974_v29 = vpop.permute.xlu1 %973  ;;  %v922_v30 = vpop.permute.xlu0 %921 }
 0x575   : > { %v952_v31 = vpop.permute.xlu0 %951  ;;  %v914_v32 = vpop.permute.xlu1 %913 }
 0x579   : > { %v985_v33 = vpop.permute.xlu1 %984  ;;  %v891_v34 = vpop.permute.xlu0 %890 }
 0x57d   : > { %v882_v35 = vpop.permute.xlu1 %881  ;;  %v932_v36 = vpop.permute.xlu0 %931 }
 0x57e   : > { %v884_v37 = vsel %vm883_vm3, %v880_v28, %v882_v35 }
 0x57f   : > { %886 = vst [vmem:[#allocation3] sm:$0xf] %v884_v37 }
 0x581   : > { %v924_v38 = vpop.permute.xlu1 %923  ;;  %v962_v39 = vpop.permute.xlu0 %961 }
 0x582   : > { %v925_v40 = vsel %vm678_vm0, %v922_v30, %v924_v38 }
 0x583   : > { %927 = vst [vmem:[#allocation3 + $0x10] sm:$0xf] %v925_v40 }
 0x585   : > { %v954_v41 = vpop.permute.xlu1 %953  ;;  %v1004_v42 = vpop.permute.xlu0 %1003 }
 0x586   : > { %v955_v43 = vsel %vm749_vm1, %v952_v31, %v954_v41 }
 0x587   : > { %957 = vst [vmem:[#allocation3 + $0x20] sm:$0xf] %v955_v43 }
 0x589   : > { %v901_v44 = vpop.permute.xlu0 %900  ;;  %v893_v45 = vpop.permute.xlu1 %892 }
 0x58a   : > { %v905_v46 = vsel %vm904_vm4, %v901_v44, %v903_v27  ;;  %v894_v47 = vsel %vm883_vm3, %v891_v34, %v893_v45  ;;  %v1014_v5 = vld [vmem:[#allocation3 + $0x10] sm:$0xff] }
 0x58b   : > { %907 = vst [vmem:[#allocation3] sm:$0xf0] %v905_v46  ;;  %896 = vst [vmem:[#allocation3 + $0x8] sm:$0xf] %v894_v47 }
 0x58d   : > { %v972_v48 = vpop.permute.xlu0 %971  ;;  %v934_v49 = vpop.permute.xlu1 %933 }
 0x58e   : > { %v976_v50 = vsel %vm975_vm5, %v972_v48, %v974_v29  ;;  %v935_v51 = vsel %vm678_vm0, %v932_v36, %v934_v49 }
 0x58f   : > { %978 = vst [vmem:[#allocation3 + $0x20] sm:$0xf0] %v976_v50  ;;  %937 = vst [vmem:[#allocation3 + $0x18] sm:$0xf] %v935_v51 }
 0x591   : > { %v912_v52 = vpop.permute.xlu0 %911  ;;  %v964_v53 = vpop.permute.xlu1 %963 }
 0x592   : > { %v915_v54 = vsel %vm904_vm4, %v912_v52, %v914_v32  ;;  %v965_v55 = vsel %vm749_vm1, %v962_v39, %v964_v53  ;;  %v1012_v63 = vld [vmem:[#allocation3] sm:$0xff] }
 0x593   : > { %917 = vst [vmem:[#allocation3 + $0x8] sm:$0xf0] %v915_v54  ;;  %967 = vst [vmem:[#allocation3 + $0x28] sm:$0xf] %v965_v55  ;;  %v1495_v6 = vpack.c.bf16 %v1014_v5, %v1012_v63 }
 0x595   : > { %v983_v56 = vpop.permute.xlu0 %982  ;;  %v1006_v57 = vpop.permute.xlu1 %1005 }
 0x596   : > { %v986_v58 = vsel %vm975_vm5, %v983_v56, %v985_v33  ;;  %v1007_v59 = vsel %vm996_vm6, %v1004_v42, %v1006_v57  ;;  %v1015_v3 = vld [vmem:[#allocation3 + $0x18] sm:$0xff]  ;;  %v1016_v10 = vld [vmem:[#allocation3 + $0x20] sm:$0xff] }
 0x597   : > { %988 = vst [vmem:[#allocation3 + $0x28] sm:$0xf0] %v986_v58  ;;  %1009 = vst [vmem:[#allocation3 + $0x38] sm:$0xf] %v1007_v59 }
 0x599   : > { %v993_v61 = vpop.permute.xlu0 %992  ;;  %v995_v62 = vpop.permute.xlu1 %994 }
 0x59a   : > { %v997_v1 = vsel %vm996_vm6, %v993_v61, %v995_v62  ;;  %v1013_v2 = vld [vmem:[#allocation3 + $0x8] sm:$0xff] }
 0x59b   : > { %999 = vst [vmem:[#allocation3 + $0x30] sm:$0xf] %v997_v1  ;;  %v1493_v4 = vpack.c.bf16 %v1015_v3, %v1013_v2 }
 0x59d   : > { %1494 = vmatprep.subr.bf16.mxu1 %v1493_v4 }
 0x59e   : > { %1496 = vmatpush1.bf16.msra.mxu1 %v1495_v6  ;;  %v1017_v7 = vld [vmem:[#allocation3 + $0x28] sm:$0xff]  ;;  %v1019_v8 = vld [vmem:[#allocation3 + $0x38] sm:$0x1f] }
 0x59f   : > { %v1497_v9 = vpack.c.bf16 %v1019_v8, %v1017_v7 }
 0x5a1   : > { %1499 = vmatprep.subr.msk.bf16.mxu1 %vm2000_vm9, %v1497_v9 }
 0x5a2   : > { %v1018_v11 = vld [vmem:[#allocation3 + $0x30] sm:$0x1f] }
 0x5a3   : > { %v1500_v12 = vpack.c.bf16 %v1018_v11, %v1016_v10 }
 0x5a5   : > { %1502 = vmatpush1.bf16.msk.msra.mxu1 %vm2000_vm9, %v1500_v12 }
 0x5a8   : > { %1450 = vmatmul.mubr.msk.f32.vlgmr.msra.gmra.mrb[2].mxu1 %vm340_vm10, %v1011_v13 }
 0x67b   : > { %v1095_v14 = vpop.f32.mrb[2].mxu1 }
 0x67c   : > { %1100 = vst [vmem:[#allocation2 + $0x4] sm:$0xf] %v1095_v14  ;;  %v1097_v15 = vpop.f32.mrb[3].mxu1 }
 0x67d   : > { %1101 = vst [vmem:[#allocation2 + $0x10] sm:$0xf] %v1097_v15  ;;  %v1234_v15 = vld [vmem:[#allocation7 + $0x10] sm:$0xf] }
 0x683   : > { %v1122_v16 = vld [vmem:[#allocation2] sm:$0xff] }
 0x684   : > { %1127 = vrot.lane.b32.xlu1 %v1122_v16, %s1797_s5  ;;  %1105 = vrot.lane.b32.xlu0 %v1122_v16, %s1795_s17  ;;  %v1640_v17 = vld [vmem:[#allocation2 + $0x10] ss:$0 sps:$4 sm:$0xff]   ;;  %v1641_v0 = vld [vmem:[#allocation2 + $0x4] ss:$0 sps:$4 sm:$0xff]   ;;  %v1104_v21 = vcombine.high %v1122_v16, %v1122_v16  ;;  %v1124_v23 = vcombine.low %v1122_v16, %v1122_v16 }
 0x685   : > { %v1193_v18 = vld [vmem:[#allocation2 + $0x4] sm:$0xff]  ;;  %1172 = vst [vmem:[#allocation3 + $0x18] sm:$0xf0] %v1640_v17  ;;  %1167 = vst [vmem:[#allocation3 + $0x10] sm:$0xf0] %v1641_v0  ;;  %v1133_v19 = vld [vmem:[#allocation2 + $0xc] sm:$0xff] }
 0x686   : > { %v1203_v20 = vld [vmem:[#allocation2 + $0x10] sm:$0xff]  ;;  %v1175_v22 = vcombine.high %v1193_v18, %v1193_v18  ;;  %v1114_v24 = vcombine.high %v1133_v19, %v1133_v19  ;;  %v1195_v25 = vcombine.low %v1193_v18, %v1193_v18  ;;  %v1135_v26 = vcombine.low %v1133_v19, %v1133_v19  ;;  %v1454_v17 = vld [vmem:[%s1965_s23 + $0x4] sm:$0xf] }
 0x687   : > { %v1185_v27 = vcombine.high %v1203_v20, %v1203_v20  ;;  %v1205_v28 = vcombine.low %v1203_v20, %v1203_v20 }
 0x688   : > { %1198 = vrot.lane.b32.xlu1 %v1193_v18, %s1797_s5  ;;  %1146 = vrot.lane.b32.xlu0 %v1122_v16, %s1793_s26  ;;  %v1323_v16 = vld [vmem:[%s1965_s23] sm:$0xf]  ;;  %s1704_s23 = sshll.u32 %s1798_s13, 4  ;;  %s1705_s23 = int_to_ptr.vmem [resolvable:$false] %s1704_s23 }
 0x689   : > { %s1706_s18 = scalar_lea.vmem %s1705_s23, 256  ;;  %p1707_p10 = scmp.lt.s32.totalorder %s2152_s22, %s1705_s23 }
 0x68a   : > { %p1708_p13 = scmp.lt.s32.totalorder %s1706_s18, %s1700_s20 }
 0x68c   : > { %1176 = vrot.lane.b32.xlu0 %v1193_v18, %s1795_s17  ;;  %1138 = vrot.lane.b32.xlu1 %v1133_v19, %s1797_s5  ;;  %p1709_p3 = por %p1708_p13, %p1707_p10 }
 0x68e   : > { %p1710_p7 = pnand %p1709_p3, %p1703_p8 }
 0x690   : > { %1208 = vrot.lane.b32.xlu1 %v1203_v20, %s1797_s5  ;;  %1115 = vrot.lane.b32.xlu0 %v1133_v19, %s1795_s17 }
 0x694   : > { %1107 = vrot.lane.b32.xlu1 %v1104_v21, %s1795_s17  ;;  %1156 = vrot.lane.b32.xlu0 %v1133_v19, %s1793_s26 }
 0x698   : > { %1148 = vrot.lane.b32.xlu1 %v1104_v21, %s1793_s26  ;;  %1186 = vrot.lane.b32.xlu0 %v1203_v20, %s1795_s17 }
 0x69c   : > { %1178 = vrot.lane.b32.xlu1 %v1175_v22, %s1795_s17  ;;  %1226 = vrot.lane.b32.xlu0 %v1203_v20, %s1793_s26 }
 0x6a0   : > { %1125 = vrot.lane.b32.xlu0 %v1124_v23, %s1797_s5  ;;  %1117 = vrot.lane.b32.xlu1 %v1114_v24, %s1795_s17 }
 0x6a4   : > { %1196 = vrot.lane.b32.xlu0 %v1195_v25, %s1797_s5  ;;  %1158 = vrot.lane.b32.xlu1 %v1114_v24, %s1793_s26 }
 0x6a8   : > { %1136 = vrot.lane.b32.xlu0 %v1135_v26, %s1797_s5  ;;  %1188 = vrot.lane.b32.xlu1 %v1185_v27, %s1795_s17 }
 0x6ac   : > { %1206 = vrot.lane.b32.xlu0 %v1205_v28, %s1797_s5  ;;  %1228 = vrot.lane.b32.xlu1 %v1185_v27, %s1793_s26 }
 0x6b0   : > { %1216 = vrot.lane.b32.xlu0 %v1193_v18, %s1793_s26  ;;  %1218 = vrot.lane.b32.xlu1 %v1175_v22, %s1793_s26 }
 0x6f6   : > { %v1128_v29 = vpop.permute.xlu1 %1127  ;;  %v1106_v30 = vpop.permute.xlu0 %1105 }
 0x6fa   : > { %v1199_v31 = vpop.permute.xlu1 %1198  ;;  %v1147_v32 = vpop.permute.xlu0 %1146 }
 0x6fe   : > { %v1177_v33 = vpop.permute.xlu0 %1176  ;;  %v1139_v34 = vpop.permute.xlu1 %1138 }
 0x702   : > { %v1209_v35 = vpop.permute.xlu1 %1208  ;;  %v1116_v36 = vpop.permute.xlu0 %1115 }
 0x706   : > { %v1108_v37 = vpop.permute.xlu1 %1107  ;;  %v1157_v38 = vpop.permute.xlu0 %1156 }
 0x707   : > { %v1109_v39 = vsel %vm975_vm5, %v1106_v30, %v1108_v37 }
 0x708   : > { %1111 = vst [vmem:[#allocation3] sm:$0xf] %v1109_v39 }
 0x70a   : > { %v1149_v40 = vpop.permute.xlu1 %1148  ;;  %v1187_v41 = vpop.permute.xlu0 %1186 }
 0x70b   : > { %v1150_v42 = vsel %vm904_vm4, %v1147_v32, %v1149_v40 }
 0x70c   : > { %1152 = vst [vmem:[#allocation3 + $0x10] sm:$0xf] %v1150_v42 }
 0x70e   : > { %v1179_v43 = vpop.permute.xlu1 %1178  ;;  %v1227_v44 = vpop.permute.xlu0 %1226 }
 0x70f   : > { %v1180_v45 = vsel %vm975_vm5, %v1177_v33, %v1179_v43 }
 0x710   : > { %1182 = vst [vmem:[#allocation3 + $0x20] sm:$0xf] %v1180_v45 }
 0x712   : > { %v1126_v46 = vpop.permute.xlu0 %1125  ;;  %v1118_v47 = vpop.permute.xlu1 %1117 }
 0x713   : > { %v1130_v48 = vsel %vm1129_vm7, %v1126_v46, %v1128_v29  ;;  %v1119_v49 = vsel %vm975_vm5, %v1116_v36, %v1118_v47  ;;  %v1237_v7 = vld [vmem:[#allocation3 + $0x10] sm:$0xff] }
 0x714   : > { %1132 = vst [vmem:[#allocation3] sm:$0xf0] %v1130_v48  ;;  %1121 = vst [vmem:[#allocation3 + $0x8] sm:$0xf] %v1119_v49 }
 0x716   : > { %v1197_v50 = vpop.permute.xlu0 %1196  ;;  %v1159_v51 = vpop.permute.xlu1 %1158 }
 0x717   : > { %v1200_v52 = vsel %vm1129_vm7, %v1197_v50, %v1199_v31  ;;  %v1160_v53 = vsel %vm904_vm4, %v1157_v38, %v1159_v51 }
 0x718   : > { %1202 = vst [vmem:[#allocation3 + $0x20] sm:$0xf0] %v1200_v52  ;;  %1162 = vst [vmem:[#allocation3 + $0x18] sm:$0xf] %v1160_v53 }
 0x71a   : > { %v1137_v54 = vpop.permute.xlu0 %1136  ;;  %v1189_v55 = vpop.permute.xlu1 %1188 }
 0x71b   : > { %v1140_v56 = vsel %vm1129_vm7, %v1137_v54, %v1139_v34  ;;  %v1190_v57 = vsel %vm975_vm5, %v1187_v41, %v1189_v55  ;;  %v1235_v2 = vld [vmem:[#allocation3] sm:$0xff] }
 0x71c   : > { %1142 = vst [vmem:[#allocation3 + $0x8] sm:$0xf0] %v1140_v56  ;;  %1192 = vst [vmem:[#allocation3 + $0x28] sm:$0xf] %v1190_v57  ;;  %v1505_v8 = vpack.c.bf16 %v1237_v7, %v1235_v2 }
 0x71e   : > { %v1207_v58 = vpop.permute.xlu0 %1206  ;;  %v1229_v59 = vpop.permute.xlu1 %1228 }
 0x71f   : > { %v1210_v61 = vsel %vm1129_vm7, %v1207_v58, %v1209_v35  ;;  %v1230_v62 = vsel %vm904_vm4, %v1227_v44, %v1229_v59  ;;  %v1238_v5 = vld [vmem:[#allocation3 + $0x18] sm:$0xff]  ;;  %v1239_v12 = vld [vmem:[#allocation3 + $0x20] sm:$0xff] }
 0x720   : > { %1212 = vst [vmem:[#allocation3 + $0x28] sm:$0xf0] %v1210_v61  ;;  %1232 = vst [vmem:[#allocation3 + $0x38] sm:$0xf] %v1230_v62 }
 0x722   : > { %v1217_v63 = vpop.permute.xlu0 %1216  ;;  %v1219_v1 = vpop.permute.xlu1 %1218 }
 0x723   : > { %v1220_v3 = vsel %vm904_vm4, %v1217_v63, %v1219_v1  ;;  %v1236_v4 = vld [vmem:[#allocation3 + $0x8] sm:$0xff] }
 0x724   : > { %1222 = vst [vmem:[#allocation3 + $0x30] sm:$0xf] %v1220_v3  ;;  %v1503_v6 = vpack.c.bf16 %v1238_v5, %v1236_v4 }
 0x726   : > { %1504 = vmatprep.subr.bf16.mxu0 %v1503_v6 }
 0x727   : > { %1506 = vmatpush1.bf16.msra.mxu0 %v1505_v8  ;;  %v1240_v9 = vld [vmem:[#allocation3 + $0x28] sm:$0xff]  ;;  %v1242_v10 = vld [vmem:[#allocation3 + $0x38] sm:$0x1f] }
 0x728   : > { %v1507_v11 = vpack.c.bf16 %v1242_v10, %v1240_v9 }
 0x72a   : > { %1509 = vmatprep.subr.msk.bf16.mxu0 %vm2000_vm9, %v1507_v11 }
 0x72b   : > { %v1241_v13 = vld [vmem:[#allocation3 + $0x30] sm:$0x1f] }
 0x72c   : > { %v1510_v14 = vpack.c.bf16 %v1241_v13, %v1239_v12 }
 0x72e   : > { %1512 = vmatpush1.bf16.msk.msra.mxu0 %vm2000_vm9, %v1510_v14 }
 0x731   : > { %1453 = vmatmul.mubr.msk.f32.vlgmr.msra.gmra.mrb[4].mxu0 %vm340_vm10, %v1234_v15 }
 0x804   : > { %v1318_v0 = vpop.f32.mrb[4].mxu0 }
 0x805   : > { %v1324_v18 = vadd.f32 %v1323_v16, %v1318_v0  ;;  %v1320_v60 = vpop.f32.mrb[5].mxu0 }
 0x806   : > { %v1327_v19 = vadd.f32 %v1454_v17, %v1320_v60 }
 0x807   : > { %1325 = vst [vmem:[%s176_s27] sm:$0xf] %v1324_v18 }
 0x808   : > { %1455 = vst [vmem:[%s176_s27 + $0x4] sm:$0xf] %v1327_v19 }
 0x809   : > { %1713 = shalt.err (!%p1710_p7)
}
 0x80a   : > { %s1714_s24 = scalar_lea.hbm %s2157_s7, 128  ;;  %s1718_s30 = scalar_lea.hbm %s2206_s2, 256 }
 0x80b   : > { %p1715_p9 = scmp.ne.s32.totalorder %s2157_s7, %s1714_s24  ;;  %p1719_p5 = scmp.lt.u32.totalorder %s2157_s7, %s2206_s2 }
 0x80c   : > { %p1720_p11 = scmp.lt.u32.totalorder %s1718_s30, %s1714_s24  ;;  %p1722_p4 = scmp.lt.u32.totalorder %s1714_s24, %s2157_s7 }
 0x80d   : > { %p1716_p1 = pnand %p1715_p9, %p1908_p12 }
 0x80e   : > { %p1721_p2 = por %p1720_p11, %p1719_p5 }
 0x80f   : > { %p1717_p0 = pneg %p1716_p1 }
 0x810   : > { %p1723_p6 = por %p1722_p4, %p1721_p2 }
 0x812   : > { %p1724_p8 = pnand %p1723_p6, %p1717_p0 }
 0x814   : > { %1727 = shalt.err (!%p1724_p8)
}
 0x815   : > { %1519 = dma.vmem_to_hbm [thread:$0]  (%p1908_p12), %s2152_s22, 128, %s2157_s7, %s1331_s29, %s1797_s5, %s1797_s5, %s1777_s15  }
 0x816 PF: > { %s1359_s27 = sand.u32 1, %s1758_s9   ;;  %p2223_p10 = scmp.ne.s32.totalorder %s2211_s16, 0 }
 0x817   : > { %p2224_p13 = scmp.ge.s32.totalorder %s1770_s12, 2  ;;  %s1360_s28 = scalar_lea.sflag [#allocation6], %s1359_s27 }
 0x819   : > { %p1530_p3 = pnand %p2224_p13, %p2223_p10 }
 0x81b   : > { %1753 = dma.done.wait (!%p1530_p3), %s1360_s28, 128  }
 0x81c   : > { %1755 = vsyncadd (!%p1530_p3), %s1360_s28, 4294967168  ;;  %p16_p7 = scmp.ge.s32.totalorder %s1870_s21, 4   ;;  %s2225_s9 = smov %s1762_s10 }
 0x81d   : > { %s2226_s10 = smov %s1766_s11  ;;  %s2227_s11 = smov %s1904_s8 }
 0x81e   : > { %s2228_s12 = smov %s1870_s21  ;;  %18 = sbr.rel (!%p16_p7) target bundleno = 6 (0x6), region = 84 }
 0x825   :  { %1365 = vsyncpa [#allocation5], 1 }
 0x826   :  { %1367 = vsyncpa [#allocation5 + $0x1], 1 }
 0x827   :  { %1368 = vsyncpa [#allocation8], 1 }
 0x828   :  { %1369 = vsyncpa [#allocation6], 1 }
 0x829   :  { %1371 = vsyncpa [#allocation6 + $0x1], 1 }

</bundles_post_ra>
